<compile_context>
chip_gen: v7x
topology: tpu7x:2x2x1
jax: 0.10.0
libtpu: 0.0.40
codegen_flags: <defaults>
</compile_context>

<pallas_src>
import functools

import jax
import jax.numpy as jnp
from jax.experimental import pallas as pl
from jax.experimental.pallas import tpu as pltpu

INPUT_SIZE = 1477
HIDDEN_SIZE = 240
OUT_SIZE = 24

# (8, 128)-aligned padded sizes.
IN_PAD = 1536      # 12 * 128
HID_PAD = 256      # 2 * 128
OUT_PAD = 128      # 1 * 128


# ---------------------------------------------------------------------------
# Fused kernel: pad-x -> input projection -> serial relu recurrence ->
# output projection, all VMEM-resident, single grid step.
# ---------------------------------------------------------------------------
def _fused_rnn_kernel(x_ref, w_ih_ref, b_rnn_ref, w_hh_ref, w_out_ref,
                      b_out_ref, o_ref, xpad_ref, xw_ref, h_ref, *,
                      seq, batch):
    # x_ref:    (seq*batch, INPUT_SIZE)      unpadded input
    # w_ih_ref: (IN_PAD, HID_PAD)            pre-transposed / zero-padded
    # b_rnn_ref:(1, HID_PAD)                 b_ih + b_hh, zero-padded
    # w_hh_ref: (HID_PAD, HID_PAD)
    # w_out_ref:(HID_PAD, OUT_PAD)
    # b_out_ref:(1, OUT_PAD)
    # o_ref:    (seq*batch, OUT_PAD)         lane-dense output
    # scratch:  xpad (M, IN_PAD), xw (M, HID_PAD), h (M, HID_PAD)

    # (1) Zero-pad x 1477 -> 1536 entirely inside VMEM (exact; K tail is zero).
    xpad_ref[...] = jnp.zeros_like(xpad_ref)
    xpad_ref[:, :INPUT_SIZE] = x_ref[...]

    # (2) Hoisted input projection: one (seq*batch, 1536) @ (1536, 256) matmul.
    xw_ref[...] = (jnp.dot(xpad_ref[...], w_ih_ref[...],
                           preferred_element_type=jnp.float32)
                   + b_rnn_ref[...])

    # (3) Serial recurrence.  First step peeled (h0 == 0 => h1 = relu(xw_0)).
    h_prev = jnp.maximum(xw_ref[:batch, :], 0.0)
    h_ref[:batch, :] = h_prev
    for t in range(1, seq):
        r0 = t * batch
        # w_hh is streamed from VMEM inside each step (not held live across
        # the unrolled loop -> minimal vreg pressure on the serial path).
        pre = xw_ref[r0:r0 + batch, :] + jnp.dot(
            h_prev, w_hh_ref[...], preferred_element_type=jnp.float32)
        h_prev = jnp.maximum(pre, 0.0)
        h_ref[r0:r0 + batch, :] = h_prev

    # (4) Hoisted output projection, lane-dense (128-wide) store.
    o_ref[...] = (jnp.dot(h_ref[...], w_out_ref[...],
                          preferred_element_type=jnp.float32)
                  + b_out_ref[...]).astype(o_ref.dtype)


# ---------------------------------------------------------------------------
# One-time parameter preparation (transpose + zero-pad), hoisted out of the
# per-call forward path.
# ---------------------------------------------------------------------------
def prepare_params(params):
    f32 = jnp.float32
    w_ih_t = jnp.zeros((IN_PAD, HID_PAD), f32).at[
        :INPUT_SIZE, :HIDDEN_SIZE].set(params["w_ih"].T)
    w_hh_t = jnp.zeros((HID_PAD, HID_PAD), f32).at[
        :HIDDEN_SIZE, :HIDDEN_SIZE].set(params["w_hh"].T)
    b_rnn = jnp.zeros((1, HID_PAD), f32).at[
        0, :HIDDEN_SIZE].set(params["b_ih"] + params["b_hh"])
    w_out_t = jnp.zeros((HID_PAD, OUT_PAD), f32).at[
        :HIDDEN_SIZE, :OUT_SIZE].set(params["w_out"].T)
    b_out = jnp.zeros((1, OUT_PAD), f32).at[0, :OUT_SIZE].set(params["b_out"])
    return {"w_ih_t": w_ih_t, "w_hh_t": w_hh_t, "b_rnn": b_rnn,
            "w_out_t": w_out_t, "b_out": b_out}


# ---------------------------------------------------------------------------
# Forward wrapper: a single fused pallas_call.
# ---------------------------------------------------------------------------
def rnn_model_forward(x, prep):
    """x: (seq, batch, INPUT_SIZE) f32 -> (seq, batch, OUT_SIZE) f32."""
    seq, batch, in_sz = x.shape
    assert in_sz == INPUT_SIZE
    M = seq * batch
    x_flat = x.reshape(M, INPUT_SIZE)

    kernel = functools.partial(_fused_rnn_kernel, seq=seq, batch=batch)

    flops = (2 * M * IN_PAD * HID_PAD
             + 2 * (seq - 1) * batch * HID_PAD * HID_PAD
             + 2 * M * HID_PAD * OUT_PAD)
    bytes_accessed = 4 * (M * INPUT_SIZE + IN_PAD * HID_PAD + HID_PAD
                          + HID_PAD * HID_PAD + HID_PAD * OUT_PAD + OUT_PAD
                          + M * OUT_PAD)

    y_pad = pl.pallas_call(
        kernel,
        out_shape=jax.ShapeDtypeStruct((M, OUT_PAD), jnp.float32),
        grid_spec=pltpu.PrefetchScalarGridSpec(
            num_scalar_prefetch=0,
            grid=(1,),
            in_specs=[
                pl.BlockSpec((M, INPUT_SIZE), lambda i: (0, 0)),   # x (unpadded)
                pl.BlockSpec((IN_PAD, HID_PAD), lambda i: (0, 0)),  # w_ih^T
                pl.BlockSpec((1, HID_PAD), lambda i: (0, 0)),       # b_ih + b_hh
                pl.BlockSpec((HID_PAD, HID_PAD), lambda i: (0, 0)),  # w_hh^T
                pl.BlockSpec((HID_PAD, OUT_PAD), lambda i: (0, 0)),  # w_out^T
                pl.BlockSpec((1, OUT_PAD), lambda i: (0, 0)),        # b_out
            ],
            out_specs=pl.BlockSpec((M, OUT_PAD), lambda i: (0, 0)),
            scratch_shapes=[
                pltpu.VMEM((M, IN_PAD), jnp.float32),   # padded x
                pltpu.VMEM((M, HID_PAD), jnp.float32),  # xw = x@W_ih^T + b
                pltpu.VMEM((M, HID_PAD), jnp.float32),  # hidden states
            ],
        ),
        compiler_params=pltpu.CompilerParams(
            dimension_semantics=("arbitrary",)),
        cost_estimate=pl.CostEstimate(flops=flops, transcendentals=0,
                                      bytes_accessed=bytes_accessed),
    )(x_flat, prep["w_ih_t"], prep["b_rnn"], prep["w_hh_t"],
      prep["w_out_t"], prep["b_out"])

    return y_pad.reshape(seq, batch, OUT_PAD)[:, :, :OUT_SIZE]


# ---------------------------------------------------------------------------
# Params / reference / test
# ---------------------------------------------------------------------------
def init_params(key):
    """Deterministic parameter init matching PyTorch module shapes."""
    k = jax.random.split(key, 6)
    bound = 1.0 / jnp.sqrt(HIDDEN_SIZE)
    u = lambda kk, shape: jax.random.uniform(kk, shape, jnp.float32, -bound, bound)
    return {
        "w_ih": u(k[0], (HIDDEN_SIZE, INPUT_SIZE)),   # nn.RNN weight_ih_l0
        "w_hh": u(k[1], (HIDDEN_SIZE, HIDDEN_SIZE)),  # nn.RNN weight_hh_l0
        "b_ih": u(k[2], (HIDDEN_SIZE,)),
        "b_hh": u(k[3], (HIDDEN_SIZE,)),
        "w_out": u(k[4], (OUT_SIZE, HIDDEN_SIZE)),    # nn.Linear weight
        "b_out": u(k[5], (OUT_SIZE,)),
    }


def reference_forward(x, params):
    """Pure-JAX reference (lax.scan) for validation."""
    w_ih_t = params["w_ih"].T
    w_hh_t = params["w_hh"].T
    b_rnn = params["b_ih"] + params["b_hh"]

    def step(h, x_t):
        h_new = jnp.maximum(x_t @ w_ih_t + h @ w_hh_t + b_rnn, 0.0)
        return h_new, h_new

    h0 = jnp.zeros((x.shape[1], HIDDEN_SIZE), jnp.float32)
    _, ys = jax.lax.scan(step, h0, x)
    return ys @ params["w_out"].T + params["b_out"]


if __name__ == "__main__":
    key = jax.random.PRNGKey(0)
    pkey, xkey = jax.random.split(key)
    params = init_params(pkey)

    # One-time weight preparation (kept out of the per-call forward path).
    prep = jax.tree_util.tree_map(jax.block_until_ready, prepare_params(params))

    seq_len, batch = 8, 2
    x = jax.random.normal(xkey, (seq_len, batch, INPUT_SIZE), jnp.float32)

    fwd = jax.jit(rnn_model_forward)
    y = jax.block_until_ready(fwd(x, prep))

    y_ref = reference_forward(x, params)
    assert y.shape == (seq_len, batch, OUT_SIZE)
    assert jnp.allclose(y, y_ref, atol=1e-4, rtol=1e-4)

    print("KERNEL_OK")
</pallas_src>

<mosaic_0001>
module attributes {stable_mosaic.version = 11 : i64} {
  func.func @_fused_rnn_kernel(%arg0: i32, %arg1: memref<16x1477xf32, #tpu.memory_space<vmem>>, %arg2: memref<1536x256xf32, #tpu.memory_space<vmem>>, %arg3: memref<1x256xf32, #tpu.memory_space<vmem>>, %arg4: memref<256x256xf32, #tpu.memory_space<vmem>>, %arg5: memref<256x128xf32, #tpu.memory_space<vmem>>, %arg6: memref<1x128xf32, #tpu.memory_space<vmem>>, %arg7: memref<16x128xf32, #tpu.memory_space<vmem>>, %arg8: memref<16x1536xf32, #tpu.memory_space<vmem>>, %arg9: memref<16x256xf32, #tpu.memory_space<vmem>>, %arg10: memref<16x256xf32, #tpu.memory_space<vmem>>) attributes {dimension_semantics = [#tpu.dimension_semantics<arbitrary>], iteration_bounds = array<i64: 1>, scalar_prefetch = 0 : i64, scratch_operands = 3 : i64, tpu.core_type = #tpu.core_type<tc>, window_params = [{pipeline_mode = #tpu.pipeline_mode<synchronous>, transform_indices = @transform_0, window_bounds = array<i64: 16, 1477>}, {pipeline_mode = #tpu.pipeline_mode<synchronous>, transform_indices = @transform_1, window_bounds = array<i64: 1536, 256>}, {pipeline_mode = #tpu.pipeline_mode<synchronous>, transform_indices = @transform_2, window_bounds = array<i64: 1, 256>}, {pipeline_mode = #tpu.pipeline_mode<synchronous>, transform_indices = @transform_3, window_bounds = array<i64: 256, 256>}, {pipeline_mode = #tpu.pipeline_mode<synchronous>, transform_indices = @transform_4, window_bounds = array<i64: 256, 128>}, {pipeline_mode = #tpu.pipeline_mode<synchronous>, transform_indices = @transform_5, window_bounds = array<i64: 1, 128>}, {pipeline_mode = #tpu.pipeline_mode<synchronous>, transform_indices = @transform_6, window_bounds = array<i64: 16, 128>}]} {
    %cst = arith.constant 0.000000e+00 : f32
    %0 = vector.broadcast %cst : f32 to vector<16x1536xf32>
    %c0 = arith.constant 0 : index
    %c0_0 = arith.constant 0 : index
    %1 = vector.load %arg8[%c0, %c0_0] : memref<16x1536xf32, #tpu.memory_space<vmem>>, vector<16x1536xf32>
    tpu.vector_store %arg8[%c0, %c0_0], %0 {strides = array<i32>} : memref<16x1536xf32, #tpu.memory_space<vmem>>, vector<16x1536xf32>,
    %c0_1 = arith.constant 0 : index
    %c0_2 = arith.constant 0 : index
    %2 = vector.load %arg1[%c0_1, %c0_2] : memref<16x1477xf32, #tpu.memory_space<vmem>>, vector<16x1477xf32>
    %c0_3 = arith.constant 0 : index
    %c0_4 = arith.constant 0 : index
    %3 = vector.load %arg8[%c0_3, %c0_4] : memref<16x1536xf32, #tpu.memory_space<vmem>>, vector<16x1477xf32>
    tpu.vector_store %arg8[%c0_3, %c0_4], %2 {strides = array<i32>} : memref<16x1536xf32, #tpu.memory_space<vmem>>, vector<16x1477xf32>,
    %c0_5 = arith.constant 0 : index
    %c0_6 = arith.constant 0 : index
    %4 = vector.load %arg8[%c0_5, %c0_6] : memref<16x1536xf32, #tpu.memory_space<vmem>>, vector<16x1536xf32>
    %c0_7 = arith.constant 0 : index
    %c0_8 = arith.constant 0 : index
    %5 = vector.load %arg2[%c0_7, %c0_8] : memref<1536x256xf32, #tpu.memory_space<vmem>>, vector<1536x256xf32>
    %cst_9 = arith.constant dense<0.000000e+00> : vector<16x256xf32>
    %6 = tpu.matmul %4, %5, %cst_9 {dimension_numbers = #tpu.dot_dimension_numbers<[1], [0], [0], [1], [0, 0, 1, 1], [], []>} : vector<16x1536xf32>, vector<1536x256xf32>, vector<16x256xf32> -> vector<16x256xf32>
    %c0_10 = arith.constant 0 : index
    %c0_11 = arith.constant 0 : index
    %7 = vector.load %arg3[%c0_10, %c0_11] : memref<1x256xf32, #tpu.memory_space<vmem>>, vector<1x256xf32>
    %8 = vector.broadcast %7 : vector<1x256xf32> to vector<16x256xf32>
    %9 = arith.addf %6, %8 : vector<16x256xf32>
    %c0_12 = arith.constant 0 : index
    %c0_13 = arith.constant 0 : index
    %10 = vector.load %arg9[%c0_12, %c0_13] : memref<16x256xf32, #tpu.memory_space<vmem>>, vector<16x256xf32>
    tpu.vector_store %arg9[%c0_12, %c0_13], %9 {strides = array<i32>} : memref<16x256xf32, #tpu.memory_space<vmem>>, vector<16x256xf32>,
    %c0_14 = arith.constant 0 : index
    %c0_15 = arith.constant 0 : index
    %11 = vector.load %arg9[%c0_14, %c0_15] : memref<16x256xf32, #tpu.memory_space<vmem>>, vector<2x256xf32>
    %cst_16 = arith.constant 0.000000e+00 : f32
    %12 = vector.broadcast %cst_16 : f32 to vector<2x256xf32>
    %13 = arith.maximumf %11, %12 : vector<2x256xf32>
    %c0_17 = arith.constant 0 : index
    %c0_18 = arith.constant 0 : index
    %14 = vector.load %arg10[%c0_17, %c0_18] : memref<16x256xf32, #tpu.memory_space<vmem>>, vector<2x256xf32>
    tpu.vector_store %arg10[%c0_17, %c0_18], %13 {strides = array<i32>} : memref<16x256xf32, #tpu.memory_space<vmem>>, vector<2x256xf32>,
    %c2 = arith.constant 2 : index
    %c0_19 = arith.constant 0 : index
    %15 = vector.load %arg9[%c2, %c0_19] : memref<16x256xf32, #tpu.memory_space<vmem>>, vector<2x256xf32>
    %c0_20 = arith.constant 0 : index
    %c0_21 = arith.constant 0 : index
    %16 = vector.load %arg4[%c0_20, %c0_21] : memref<256x256xf32, #tpu.memory_space<vmem>>, vector<256x256xf32>
    %cst_22 = arith.constant dense<0.000000e+00> : vector<2x256xf32>
    %17 = tpu.matmul %13, %16, %cst_22 {dimension_numbers = #tpu.dot_dimension_numbers<[1], [0], [0], [1], [0, 0, 1, 1], [], []>} : vector<2x256xf32>, vector<256x256xf32>, vector<2x256xf32> -> vector<2x256xf32>
    %18 = arith.addf %15, %17 : vector<2x256xf32>
    %cst_23 = arith.constant 0.000000e+00 : f32
    %19 = vector.broadcast %cst_23 : f32 to vector<2x256xf32>
    %20 = arith.maximumf %18, %19 : vector<2x256xf32>
    %c2_24 = arith.constant 2 : index
    %c0_25 = arith.constant 0 : index
    %21 = vector.load %arg10[%c2_24, %c0_25] : memref<16x256xf32, #tpu.memory_space<vmem>>, vector<2x256xf32>
    tpu.vector_store %arg10[%c2_24, %c0_25], %20 {strides = array<i32>} : memref<16x256xf32, #tpu.memory_space<vmem>>, vector<2x256xf32>,
    %c4 = arith.constant 4 : index
    %c0_26 = arith.constant 0 : index
    %22 = vector.load %arg9[%c4, %c0_26] : memref<16x256xf32, #tpu.memory_space<vmem>>, vector<2x256xf32>
    %c0_27 = arith.constant 0 : index
    %c0_28 = arith.constant 0 : index
    %23 = vector.load %arg4[%c0_27, %c0_28] : memref<256x256xf32, #tpu.memory_space<vmem>>, vector<256x256xf32>
    %cst_29 = arith.constant dense<0.000000e+00> : vector<2x256xf32>
    %24 = tpu.matmul %20, %23, %cst_29 {dimension_numbers = #tpu.dot_dimension_numbers<[1], [0], [0], [1], [0, 0, 1, 1], [], []>} : vector<2x256xf32>, vector<256x256xf32>, vector<2x256xf32> -> vector<2x256xf32>
    %25 = arith.addf %22, %24 : vector<2x256xf32>
    %cst_30 = arith.constant 0.000000e+00 : f32
    %26 = vector.broadcast %cst_30 : f32 to vector<2x256xf32>
    %27 = arith.maximumf %25, %26 : vector<2x256xf32>
    %c4_31 = arith.constant 4 : index
    %c0_32 = arith.constant 0 : index
    %28 = vector.load %arg10[%c4_31, %c0_32] : memref<16x256xf32, #tpu.memory_space<vmem>>, vector<2x256xf32>
    tpu.vector_store %arg10[%c4_31, %c0_32], %27 {strides = array<i32>} : memref<16x256xf32, #tpu.memory_space<vmem>>, vector<2x256xf32>,
    %c6 = arith.constant 6 : index
    %c0_33 = arith.constant 0 : index
    %29 = vector.load %arg9[%c6, %c0_33] : memref<16x256xf32, #tpu.memory_space<vmem>>, vector<2x256xf32>
    %c0_34 = arith.constant 0 : index
    %c0_35 = arith.constant 0 : index
    %30 = vector.load %arg4[%c0_34, %c0_35] : memref<256x256xf32, #tpu.memory_space<vmem>>, vector<256x256xf32>
    %cst_36 = arith.constant dense<0.000000e+00> : vector<2x256xf32>
    %31 = tpu.matmul %27, %30, %cst_36 {dimension_numbers = #tpu.dot_dimension_numbers<[1], [0], [0], [1], [0, 0, 1, 1], [], []>} : vector<2x256xf32>, vector<256x256xf32>, vector<2x256xf32> -> vector<2x256xf32>
    %32 = arith.addf %29, %31 : vector<2x256xf32>
    %cst_37 = arith.constant 0.000000e+00 : f32
    %33 = vector.broadcast %cst_37 : f32 to vector<2x256xf32>
    %34 = arith.maximumf %32, %33 : vector<2x256xf32>
    %c6_38 = arith.constant 6 : index
    %c0_39 = arith.constant 0 : index
    %35 = vector.load %arg10[%c6_38, %c0_39] : memref<16x256xf32, #tpu.memory_space<vmem>>, vector<2x256xf32>
    tpu.vector_store %arg10[%c6_38, %c0_39], %34 {strides = array<i32>} : memref<16x256xf32, #tpu.memory_space<vmem>>, vector<2x256xf32>,
    %c8 = arith.constant 8 : index
    %c0_40 = arith.constant 0 : index
    %36 = vector.load %arg9[%c8, %c0_40] : memref<16x256xf32, #tpu.memory_space<vmem>>, vector<2x256xf32>
    %c0_41 = arith.constant 0 : index
    %c0_42 = arith.constant 0 : index
    %37 = vector.load %arg4[%c0_41, %c0_42] : memref<256x256xf32, #tpu.memory_space<vmem>>, vector<256x256xf32>
    %cst_43 = arith.constant dense<0.000000e+00> : vector<2x256xf32>
    %38 = tpu.matmul %34, %37, %cst_43 {dimension_numbers = #tpu.dot_dimension_numbers<[1], [0], [0], [1], [0, 0, 1, 1], [], []>} : vector<2x256xf32>, vector<256x256xf32>, vector<2x256xf32> -> vector<2x256xf32>
    %39 = arith.addf %36, %38 : vector<2x256xf32>
    %cst_44 = arith.constant 0.000000e+00 : f32
    %40 = vector.broadcast %cst_44 : f32 to vector<2x256xf32>
    %41 = arith.maximumf %39, %40 : vector<2x256xf32>
    %c8_45 = arith.constant 8 : index
    %c0_46 = arith.constant 0 : index
    %42 = vector.load %arg10[%c8_45, %c0_46] : memref<16x256xf32, #tpu.memory_space<vmem>>, vector<2x256xf32>
    tpu.vector_store %arg10[%c8_45, %c0_46], %41 {strides = array<i32>} : memref<16x256xf32, #tpu.memory_space<vmem>>, vector<2x256xf32>,
    %c10 = arith.constant 10 : index
    %c0_47 = arith.constant 0 : index
    %43 = vector.load %arg9[%c10, %c0_47] : memref<16x256xf32, #tpu.memory_space<vmem>>, vector<2x256xf32>
    %c0_48 = arith.constant 0 : index
    %c0_49 = arith.constant 0 : index
    %44 = vector.load %arg4[%c0_48, %c0_49] : memref<256x256xf32, #tpu.memory_space<vmem>>, vector<256x256xf32>
    %cst_50 = arith.constant dense<0.000000e+00> : vector<2x256xf32>
    %45 = tpu.matmul %41, %44, %cst_50 {dimension_numbers = #tpu.dot_dimension_numbers<[1], [0], [0], [1], [0, 0, 1, 1], [], []>} : vector<2x256xf32>, vector<256x256xf32>, vector<2x256xf32> -> vector<2x256xf32>
    %46 = arith.addf %43, %45 : vector<2x256xf32>
    %cst_51 = arith.constant 0.000000e+00 : f32
    %47 = vector.broadcast %cst_51 : f32 to vector<2x256xf32>
    %48 = arith.maximumf %46, %47 : vector<2x256xf32>
    %c10_52 = arith.constant 10 : index
    %c0_53 = arith.constant 0 : index
    %49 = vector.load %arg10[%c10_52, %c0_53] : memref<16x256xf32, #tpu.memory_space<vmem>>, vector<2x256xf32>
    tpu.vector_store %arg10[%c10_52, %c0_53], %48 {strides = array<i32>} : memref<16x256xf32, #tpu.memory_space<vmem>>, vector<2x256xf32>,
    %c12 = arith.constant 12 : index
    %c0_54 = arith.constant 0 : index
    %50 = vector.load %arg9[%c12, %c0_54] : memref<16x256xf32, #tpu.memory_space<vmem>>, vector<2x256xf32>
    %c0_55 = arith.constant 0 : index
    %c0_56 = arith.constant 0 : index
    %51 = vector.load %arg4[%c0_55, %c0_56] : memref<256x256xf32, #tpu.memory_space<vmem>>, vector<256x256xf32>
    %cst_57 = arith.constant dense<0.000000e+00> : vector<2x256xf32>
    %52 = tpu.matmul %48, %51, %cst_57 {dimension_numbers = #tpu.dot_dimension_numbers<[1], [0], [0], [1], [0, 0, 1, 1], [], []>} : vector<2x256xf32>, vector<256x256xf32>, vector<2x256xf32> -> vector<2x256xf32>
    %53 = arith.addf %50, %52 : vector<2x256xf32>
    %cst_58 = arith.constant 0.000000e+00 : f32
    %54 = vector.broadcast %cst_58 : f32 to vector<2x256xf32>
    %55 = arith.maximumf %53, %54 : vector<2x256xf32>
    %c12_59 = arith.constant 12 : index
    %c0_60 = arith.constant 0 : index
    %56 = vector.load %arg10[%c12_59, %c0_60] : memref<16x256xf32, #tpu.memory_space<vmem>>, vector<2x256xf32>
    tpu.vector_store %arg10[%c12_59, %c0_60], %55 {strides = array<i32>} : memref<16x256xf32, #tpu.memory_space<vmem>>, vector<2x256xf32>,
    %c14 = arith.constant 14 : index
    %c0_61 = arith.constant 0 : index
    %57 = vector.load %arg9[%c14, %c0_61] : memref<16x256xf32, #tpu.memory_space<vmem>>, vector<2x256xf32>
    %c0_62 = arith.constant 0 : index
    %c0_63 = arith.constant 0 : index
    %58 = vector.load %arg4[%c0_62, %c0_63] : memref<256x256xf32, #tpu.memory_space<vmem>>, vector<256x256xf32>
    %cst_64 = arith.constant dense<0.000000e+00> : vector<2x256xf32>
    %59 = tpu.matmul %55, %58, %cst_64 {dimension_numbers = #tpu.dot_dimension_numbers<[1], [0], [0], [1], [0, 0, 1, 1], [], []>} : vector<2x256xf32>, vector<256x256xf32>, vector<2x256xf32> -> vector<2x256xf32>
    %60 = arith.addf %57, %59 : vector<2x256xf32>
    %cst_65 = arith.constant 0.000000e+00 : f32
    %61 = vector.broadcast %cst_65 : f32 to vector<2x256xf32>
    %62 = arith.maximumf %60, %61 : vector<2x256xf32>
    %c14_66 = arith.constant 14 : index
    %c0_67 = arith.constant 0 : index
    %63 = vector.load %arg10[%c14_66, %c0_67] : memref<16x256xf32, #tpu.memory_space<vmem>>, vector<2x256xf32>
    tpu.vector_store %arg10[%c14_66, %c0_67], %62 {strides = array<i32>} : memref<16x256xf32, #tpu.memory_space<vmem>>, vector<2x256xf32>,
    %c0_68 = arith.constant 0 : index
    %c0_69 = arith.constant 0 : index
    %64 = vector.load %arg10[%c0_68, %c0_69] : memref<16x256xf32, #tpu.memory_space<vmem>>, vector<16x256xf32>
    %c0_70 = arith.constant 0 : index
    %c0_71 = arith.constant 0 : index
    %65 = vector.load %arg5[%c0_70, %c0_71] : memref<256x128xf32, #tpu.memory_space<vmem>>, vector<256x128xf32>
    %cst_72 = arith.constant dense<0.000000e+00> : vector<16x128xf32>
    %66 = tpu.matmul %64, %65, %cst_72 {dimension_numbers = #tpu.dot_dimension_numbers<[1], [0], [0], [1], [0, 0, 1, 1], [], []>} : vector<16x256xf32>, vector<256x128xf32>, vector<16x128xf32> -> vector<16x128xf32>
    %c0_73 = arith.constant 0 : index
    %c0_74 = arith.constant 0 : index
    %67 = vector.load %arg6[%c0_73, %c0_74] : memref<1x128xf32, #tpu.memory_space<vmem>>, vector<1x128xf32>
    %68 = vector.broadcast %67 : vector<1x128xf32> to vector<16x128xf32>
    %69 = arith.addf %66, %68 : vector<16x128xf32>
    %c0_75 = arith.constant 0 : index
    %c0_76 = arith.constant 0 : index
    %70 = vector.load %arg7[%c0_75, %c0_76] : memref<16x128xf32, #tpu.memory_space<vmem>>, vector<16x128xf32>
    tpu.vector_store %arg7[%c0_75, %c0_76], %69 {strides = array<i32>} : memref<16x128xf32, #tpu.memory_space<vmem>>, vector<16x128xf32>,
    return
  }
  func.func @transform_0(%arg0: i32) -> (i32, i32) {
    %c0_i32 = arith.constant 0 : i32
    %c0_i32_0 = arith.constant 0 : i32
    %c0_i32_1 = arith.constant 0 : i32
    return %c0_i32, %c0_i32_0 : i32, i32
  }
  func.func @transform_1(%arg0: i32) -> (i32, i32) {
    %c0_i32 = arith.constant 0 : i32
    %c0_i32_0 = arith.constant 0 : i32
    %c0_i32_1 = arith.constant 0 : i32
    return %c0_i32, %c0_i32_0 : i32, i32
  }
  func.func @transform_2(%arg0: i32) -> (i32, i32) {
    %c0_i32 = arith.constant 0 : i32
    %c0_i32_0 = arith.constant 0 : i32
    %c0_i32_1 = arith.constant 0 : i32
    return %c0_i32, %c0_i32_0 : i32, i32
  }
  func.func @transform_3(%arg0: i32) -> (i32, i32) {
    %c0_i32 = arith.constant 0 : i32
    %c0_i32_0 = arith.constant 0 : i32
    %c0_i32_1 = arith.constant 0 : i32
    return %c0_i32, %c0_i32_0 : i32, i32
  }
  func.func @transform_4(%arg0: i32) -> (i32, i32) {
    %c0_i32 = arith.constant 0 : i32
    %c0_i32_0 = arith.constant 0 : i32
    %c0_i32_1 = arith.constant 0 : i32
    return %c0_i32, %c0_i32_0 : i32, i32
  }
  func.func @transform_5(%arg0: i32) -> (i32, i32) {
    %c0_i32 = arith.constant 0 : i32
    %c0_i32_0 = arith.constant 0 : i32
    %c0_i32_1 = arith.constant 0 : i32
    return %c0_i32, %c0_i32_0 : i32, i32
  }
  func.func @transform_6(%arg0: i32) -> (i32, i32) {
    %c0_i32 = arith.constant 0 : i32
    %c0_i32_0 = arith.constant 0 : i32
    %c0_i32_1 = arith.constant 0 : i32
    return %c0_i32, %c0_i32_0 : i32, i32
  }
}

</mosaic_0001>

<bundles_post_ra>
// kernel: rnn_model_forward.1
= control target key start
LH: loop header
LB: loop body
LE: loop exit
PB: predicated region body
PF: predicated region fallthrough
CT: control target
= control target key end

     0   :  { %11 = vsyncpa [#allocation6], 0  ;;  %s3937_s0 = inlined_call_operand.vmem [shape: f32[16,1477], index: 0, kind: input, shape index: {}]   ;;  %s3938_s1 = inlined_call_operand.hbm [shape: f32[1536,256], index: 1, kind: input, shape index: {}]   ;;  %s3939_s2 = inlined_call_operand.hbm [shape: f32[1,256], index: 2, kind: input, shape index: {}]   ;;  %s3940_s3 = inlined_call_operand.hbm [shape: f32[256,256], index: 3, kind: input, shape index: {}]   ;;  %s3941_s4 = inlined_call_operand.hbm [shape: f32[256,128], index: 4, kind: input, shape index: {}]   ;;  %s3942_s5 = inlined_call_operand.hbm [shape: f32[1,128], index: 5, kind: input, shape index: {}]   ;;  %s3943_s6 = inlined_call_operand.hbm [shape: f32[16,128], index: 6, kind: output, shape index: {}]  }
   0x1   :  { %12 = vsyncpa [#allocation9], 0 }
   0x2   :  { %13 = vsyncpa [#allocation12], 0 }
   0x3   :  { %14 = vsyncpa [#allocation7], 0  ;;  %s3337_s21 = smov [#allocation8]   ;;  %s3338_s23 = smov [#allocation11]  }
   0x4   :  { %s35_s22 = sshll.u32 %s3337_s21, 4  ;;  %s56_s24 = sshll.u32 %s3338_s23, 4  ;;  %s36_s22 = int_to_ptr.vmem [resolvable:$true] %s35_s22  ;;  %s3383_s24 = int_to_ptr.vmem [resolvable:$true] %s56_s24 }
   0x5   :  { %s3197_s27 = scalar_lea.hbm %s3939_s2, 32 }
   0x6   :  { %p3198_p0 = scmp.ne.s32.totalorder %s3939_s2, %s3197_s27  ;;  %p3201_p1 = scmp.lt.u32.totalorder %s3197_s27, %s3939_s2 }
   0x8   :  { %p3203_p2 = pnand %p3201_p1, %p3198_p0 }
   0xa   :  { %3206 = shalt.err (!%p3203_p2)
}
   0xb   :  { %s3207_s8 = scalar_lea.vmem %s36_s22, 32  ;;  %p3212_p4 = scmp.lt.s32.totalorder %s36_s22, %s36_s22 }
   0xc   :  { %p3208_p3 = scmp.ne.s32.totalorder %s36_s22, %s3207_s8  ;;  %p3213_p5 = scmp.lt.s32.totalorder %s3207_s8, %s3207_s8 }
   0xe   :  { %p3214_p6 = por %p3213_p5, %p3212_p4 }
  0x10   :  { %p3215_p7 = pnand %p3214_p6, %p3208_p3 }
  0x12   :  { %3218 = shalt.err (!%p3215_p7)
}
  0x13   :  { %38 = dma.hbm_to_vmem [thread:$0]  %s3939_s2, 32, %s36_s22, [#allocation9]  }
  0x14   :  { %s3219_s13 = scalar_lea.hbm %s3941_s4, 4096 }
  0x15   :  { %p3220_p8 = scmp.ne.s32.totalorder %s3941_s4, %s3219_s13  ;;  %p3223_p9 = scmp.lt.u32.totalorder %s3219_s13, %s3941_s4 }
  0x17   :  { %p3225_p10 = pnand %p3223_p9, %p3220_p8 }
  0x19   :  { %3228 = shalt.err (!%p3225_p10)
}
  0x1a   :  { %s3229_s18 = scalar_lea.vmem %s3383_s24, 4096  ;;  %p3234_p12 = scmp.lt.s32.totalorder %s3383_s24, %s3383_s24 }
  0x1b   :  { %p3230_p11 = scmp.ne.s32.totalorder %s3383_s24, %s3229_s18  ;;  %p3235_p13 = scmp.lt.s32.totalorder %s3229_s18, %s3229_s18 }
  0x1d   :  { %p3236_p0 = por %p3235_p13, %p3234_p12 }
  0x1f   :  { %p3237_p1 = pnand %p3236_p0, %p3230_p11 }
  0x21   :  { %3240 = shalt.err (!%p3237_p1)
}
  0x22   :  { %s3339_s2 = smov 128   ;;  %s3340_s19 = smov 8  }
  0x23   :  { %62 = dma.hbm_to_vmem [thread:$0]  %s3941_s4, 4096, %s3383_s24, [#allocation12], %s3339_s2, %s3339_s2, %s3340_s19  }
  0x24   :  { %s3341_s22 = smov [#allocation5]   ;;  %s3241_s27 = scalar_lea.hbm %s3938_s1, 49152 }
  0x25   :  { %s22_s23 = sshll.u32 %s3341_s22, 4  ;;  %p3242_p2 = scmp.ne.s32.totalorder %s3938_s1, %s3241_s27  ;;  %s23_s23 = int_to_ptr.vmem [resolvable:$true] %s22_s23 }
  0x26   :  { %p3245_p3 = scmp.lt.u32.totalorder %s3241_s27, %s3938_s1 }
  0x28   :  { %p3247_p4 = pnand %p3245_p3, %p3242_p2 }
  0x2a   :  { %3250 = shalt.err (!%p3247_p4)
}
  0x2b   :  { %s3251_s8 = scalar_lea.vmem %s23_s23, 49152  ;;  %p3256_p6 = scmp.lt.s32.totalorder %s23_s23, %s23_s23 }
  0x2c   :  { %p3252_p5 = scmp.ne.s32.totalorder %s23_s23, %s3251_s8  ;;  %p3257_p7 = scmp.lt.s32.totalorder %s3251_s8, %s3251_s8 }
  0x2e   :  { %p3258_p8 = por %p3257_p7, %p3256_p6 }
  0x30   :  { %p3259_p9 = pnand %p3258_p8, %p3252_p5 }
  0x32   :  { %3262 = shalt.err (!%p3259_p9)
}
  0x33   :  { %s3342_s4 = smov 256   ;;  %s3343_s24 = smov 16  }
  0x34   :  { %28 = dma.hbm_to_vmem [thread:$0]  %s3938_s1, 49152, %s23_s23, [#allocation6], %s3342_s4, %s3342_s4, %s3343_s24  }
  0x35   :  { %s3344_s11 = smov [#allocation10]   ;;  %s3345_s13 = smov [#allocation13]  }
  0x36   :  { %s44_s12 = sshll.u32 %s3344_s11, 4  ;;  %s69_s14 = sshll.u32 %s3345_s13, 4  ;;  %s45_s12 = int_to_ptr.vmem [resolvable:$true] %s44_s12  ;;  %s70_s14 = int_to_ptr.vmem [resolvable:$true] %s69_s14 }
  0x37   :  { %s3263_s17 = scalar_lea.hbm %s3940_s3, 8192 }
  0x38   :  { %p3264_p10 = scmp.ne.s32.totalorder %s3940_s3, %s3263_s17  ;;  %p3267_p11 = scmp.lt.u32.totalorder %s3263_s17, %s3940_s3 }
  0x3a   :  { %p3269_p12 = pnand %p3267_p11, %p3264_p10 }
  0x3c   :  { %3272 = shalt.err (!%p3269_p12)
}
  0x3d   :  { %s3273_s1 = scalar_lea.vmem %s45_s12, 8192  ;;  %p3278_p0 = scmp.lt.s32.totalorder %s45_s12, %s45_s12 }
  0x3e   :  { %p3274_p13 = scmp.ne.s32.totalorder %s45_s12, %s3273_s1  ;;  %p3279_p1 = scmp.lt.s32.totalorder %s3273_s1, %s3273_s1 }
  0x40   :  { %p3280_p2 = por %p3279_p1, %p3278_p0 }
  0x42   :  { %p3281_p3 = pnand %p3280_p2, %p3274_p13 }
  0x44   :  { %3284 = shalt.err (!%p3281_p3)
}
  0x45   :  { %50 = dma.hbm_to_vmem [thread:$0]  %s3940_s3, 8192, %s45_s12, [#allocation9], %s3342_s4, %s3342_s4, %s3343_s24  }
  0x46   :  { %s3285_s28 = scalar_lea.hbm %s3942_s5, 16 }
  0x47   :  { %p3286_p4 = scmp.ne.s32.totalorder %s3942_s5, %s3285_s28  ;;  %p3289_p5 = scmp.lt.u32.totalorder %s3285_s28, %s3942_s5 }
  0x49   :  { %p3291_p6 = pnand %p3289_p5, %p3286_p4 }
  0x4b   :  { %3294 = shalt.err (!%p3291_p6)
}
  0x4c   :  { %s3295_s9 = scalar_lea.vmem %s70_s14, 16  ;;  %s3299_s10 = scalar_lea.vmem %s70_s14, 32 }
  0x4d   :  { %p3296_p7 = scmp.ne.s32.totalorder %s70_s14, %s3295_s9  ;;  %p3300_p8 = scmp.lt.s32.totalorder %s70_s14, %s70_s14 }
  0x4e   :  { %p3301_p9 = scmp.lt.s32.totalorder %s3299_s10, %s3295_s9 }
  0x50   :  { %p3302_p10 = por %p3301_p9, %p3300_p8 }
  0x52   :  { %p3303_p11 = pnand %p3302_p10, %p3296_p7 }
  0x54   :  { %3306 = shalt.err (!%p3303_p11)
}
  0x55   :  { %72 = dma.hbm_to_vmem [thread:$0]  %s3942_s5, 16, %s70_s14, [#allocation12]  }
  0x56   :  { %3329 = dma.done.wait [#allocation6], 49152  }
  0x57   :  { %3330 = vsyncadd [#allocation6], 4294918144 }
  0x58   :  { %3331 = dma.done.wait [#allocation9], 8224  }
  0x59   :  { %3332 = vsyncadd [#allocation9], 4294959072 }
  0x5a   :  { %3333 = dma.done.wait [#allocation12], 4112  }
  0x5b   :  { %3334 = vsyncadd [#allocation12], 4294963184  ;;  %v3346_v0 = vmov 0.0   ;;  %v186_v1 = vld [vmem:[#allocation5 + $0x8] sm:$0xff]  ;;  %v188_v2 = vld [vmem:[#allocation5 + $0x18] sm:$0xff]  ;;  %vm147_vm0 = vcmask 564224  }
  0x5c   :  { %99 = vst [vmem:[#allocation2 + $0x58] sm:$0xff] %v3346_v0  ;;  %111 = vst [vmem:[#allocation2 + $0xb8] sm:$0xff] %v3346_v0  ;;  %v185_v3 = vld [vmem:[#allocation5] sm:$0xff]  ;;  %v2298_v4 = vpack.c.bf16 %v188_v2, %v186_v1  ;;  %v187_v5 = vld [vmem:[#allocation5 + $0x10] sm:$0xff] }
  0x5d   :  { %v190_v6 = vld [vmem:[#allocation5 + $0x28] sm:$0xff]  ;;  %v192_v7 = vld [vmem:[#allocation5 + $0x38] sm:$0xff]  ;;  %v2300_v8 = vpack.c.bf16 %v187_v5, %v185_v3  ;;  %v189_v10 = vld [vmem:[#allocation5 + $0x20] sm:$0xff] }
  0x5e   :  { %v2302_v9 = vpack.c.bf16 %v192_v7, %v190_v6  ;;  %v191_v11 = vld [vmem:[#allocation5 + $0x30] sm:$0xff]  ;;  %v194_v12 = vld [vmem:[#allocation5 + $0x48] sm:$0xff]  ;;  %2299 = vmatprep.subr.bf16.mxu0 %v2298_v4  ;;  %v196_v13 = vld [vmem:[#allocation5 + $0x58] sm:$0xff] }
  0x5f   :  { %2301 = vmatpush1.bf16.msra.mxu0 %v2300_v8  ;;  %v2304_v14 = vpack.c.bf16 %v191_v11, %v189_v10  ;;  %v2306_v15 = vpack.c.bf16 %v196_v13, %v194_v12  ;;  %v193_v16 = vld [vmem:[#allocation5 + $0x40] sm:$0xff]  ;;  %v195_v17 = vld [vmem:[#allocation5 + $0x50] sm:$0xff]  ;;  %v198_v18 = vld [vmem:[#allocation5 + $0x68] sm:$0xff] }
  0x60   :  { %2303 = vmatprep.subr.bf16.mxu0 %v2302_v9  ;;  %v200_v19 = vld [vmem:[#allocation5 + $0x78] sm:$0xff]  ;;  %v2308_v20 = vpack.c.bf16 %v195_v17, %v193_v16  ;;  %v197_v22 = vld [vmem:[#allocation5 + $0x60] sm:$0xff]  ;;  %v199_v23 = vld [vmem:[#allocation5 + $0x70] sm:$0xff] }
  0x61   :  { %v2310_v21 = vpack.c.bf16 %v200_v19, %v198_v18  ;;  %v202_v24 = vld [vmem:[#allocation5 + $0x88] sm:$0xff]  ;;  %v204_v25 = vld [vmem:[#allocation5 + $0x98] sm:$0xff]  ;;  %v2312_v26 = vpack.c.bf16 %v199_v23, %v197_v22  ;;  %v201_v28 = vld [vmem:[#allocation5 + $0x80] sm:$0xff] }
  0x62   :  { %v2314_v27 = vpack.c.bf16 %v204_v25, %v202_v24  ;;  %v203_v29 = vld [vmem:[#allocation5 + $0x90] sm:$0xff]  ;;  %v206_v30 = vld [vmem:[#allocation5 + $0xa8] sm:$0xff]  ;;  %v208_v31 = vld [vmem:[#allocation5 + $0xb8] sm:$0xff] }
  0x63   :  { %2305 = vmatpush1.bf16.msra.mxu0 %v2304_v14  ;;  %v2316_v32 = vpack.c.bf16 %v203_v29, %v201_v28  ;;  %v2318_v33 = vpack.c.bf16 %v208_v31, %v206_v30  ;;  %v205_v34 = vld [vmem:[#allocation5 + $0xa0] sm:$0xff]  ;;  %v207_v35 = vld [vmem:[#allocation5 + $0xb0] sm:$0xff]  ;;  %v210_v36 = vld [vmem:[#allocation5 + $0xc8] sm:$0xff] }
  0x64   :  { %2307 = vmatprep.subr.bf16.mxu0 %v2306_v15  ;;  %v212_v37 = vld [vmem:[#allocation5 + $0xd8] sm:$0xff]  ;;  %v2320_v38 = vpack.c.bf16 %v207_v35, %v205_v34  ;;  %v209_v40 = vld [vmem:[#allocation5 + $0xc0] sm:$0xff]  ;;  %v211_v41 = vld [vmem:[#allocation5 + $0xd0] sm:$0xff] }
  0x65   :  { %v2322_v39 = vpack.c.bf16 %v212_v37, %v210_v36  ;;  %v113_v42 = vld [vmem:[%s3937_s0 + $0x8] sm:$0xff]  ;;  %v216_v44 = vld [vmem:[#allocation5 + $0xf8] sm:$0xff]  ;;  %v3459_v45 = vld [vmem:[%s3937_s0] sm:$0xff]  ;;  %v2324_v46 = vpack.c.bf16 %v211_v41, %v209_v40 }
  0x66   :  { %v214_v43 = vld [vmem:[#allocation5 + $0xe8] sm:$0xff]  ;;  %645 = vmatprep.mubr.f32.mxu0 %v113_v42  ;;  %v213_v48 = vld [vmem:[#allocation5 + $0xe0] sm:$0xff]  ;;  %v215_v49 = vld [vmem:[#allocation5 + $0xf0] sm:$0xff] }
  0x67   :  { %2309 = vmatpush1.bf16.msra.mxu0 %v2308_v20  ;;  %v2326_v47 = vpack.c.bf16 %v216_v44, %v214_v43  ;;  %v218_v50 = vld [vmem:[#allocation5 + $0x108] sm:$0xff]  ;;  %v220_v51 = vld [vmem:[#allocation5 + $0x118] sm:$0xff]  ;;  %v2328_v52 = vpack.c.bf16 %v215_v49, %v213_v48  ;;  %v217_v54 = vld [vmem:[#allocation5 + $0x100] sm:$0xff] }
  0x68   :  { %2311 = vmatprep.subr.bf16.mxu0 %v2310_v21  ;;  %v2330_v53 = vpack.c.bf16 %v220_v51, %v218_v50  ;;  %v219_v55 = vld [vmem:[#allocation5 + $0x110] sm:$0xff]  ;;  %v222_v56 = vld [vmem:[#allocation5 + $0x128] sm:$0xff]  ;;  %v224_v57 = vld [vmem:[#allocation5 + $0x138] sm:$0xff] }
  0x69   :  { %v2332_v58 = vpack.c.bf16 %v219_v55, %v217_v54  ;;  %v2334_v59 = vpack.c.bf16 %v224_v57, %v222_v56  ;;  %v221_v60 = vld [vmem:[#allocation5 + $0x120] sm:$0xff]  ;;  %v223_v61 = vld [vmem:[#allocation5 + $0x130] sm:$0xff]  ;;  %v226_v62 = vld [vmem:[#allocation5 + $0x148] sm:$0xff] }
  0x6a   :  { %v228_v63 = vld [vmem:[#allocation5 + $0x158] sm:$0xff]  ;;  %v2336_v0 = vpack.c.bf16 %v223_v61, %v221_v60  ;;  %v225_v2 = vld [vmem:[#allocation5 + $0x140] sm:$0xff]  ;;  %v227_v3 = vld [vmem:[#allocation5 + $0x150] sm:$0xff] }
  0x6b   :  { %2313 = vmatpush1.bf16.msra.mxu0 %v2312_v26  ;;  %v2338_v1 = vpack.c.bf16 %v228_v63, %v226_v62  ;;  %v230_v4 = vld [vmem:[#allocation5 + $0x168] sm:$0xff]  ;;  %v232_v5 = vld [vmem:[#allocation5 + $0x178] sm:$0xff]  ;;  %v2340_v6 = vpack.c.bf16 %v227_v3, %v225_v2  ;;  %v229_v8 = vld [vmem:[#allocation5 + $0x160] sm:$0xff] }
  0x6c   :  { %2315 = vmatprep.subr.bf16.mxu0 %v2314_v27  ;;  %v2342_v7 = vpack.c.bf16 %v232_v5, %v230_v4  ;;  %v231_v9 = vld [vmem:[#allocation5 + $0x170] sm:$0xff]  ;;  %v234_v10 = vld [vmem:[#allocation5 + $0x188] sm:$0xff]  ;;  %v236_v11 = vld [vmem:[#allocation5 + $0x198] sm:$0xff] }
  0x6d   :  { %v125_v12 = vld [vmem:[%s3937_s0 + $0x68] sm:$0xff]  ;;  %v3467_v13 = vld [vmem:[%s3937_s0 + $0x60] sm:$0xff]  ;;  %v2344_v14 = vpack.c.bf16 %v231_v9, %v229_v8  ;;  %v3472_v15 = vld [vmem:[%s3937_s0 + $0x18] sm:$0xff]  ;;  %v2346_v16 = vpack.c.bf16 %v236_v11, %v234_v10 }
  0x6e   :  { %v233_v17 = vld [vmem:[#allocation5 + $0x180] sm:$0xff]  ;;  %v235_v18 = vld [vmem:[#allocation5 + $0x190] sm:$0xff]  ;;  %v238_v20 = vld [vmem:[#allocation5 + $0x1a8] sm:$0xff] }
  0x6f   :  { %2317 = vmatpush1.bf16.msra.mxu0 %v2316_v32  ;;  %v3477_v19 = vld [vmem:[%s3937_s0 + $0x10] sm:$0xff]  ;;  %v240_v21 = vld [vmem:[#allocation5 + $0x1b8] sm:$0xff]  ;;  %v2348_v22 = vpack.c.bf16 %v235_v18, %v233_v17  ;;  %v237_v24 = vld [vmem:[#allocation5 + $0x1a0] sm:$0xff] }
  0x70   :  { %2319 = vmatprep.subr.bf16.mxu0 %v2318_v33  ;;  %v2350_v23 = vpack.c.bf16 %v240_v21, %v238_v20  ;;  %v239_v25 = vld [vmem:[#allocation5 + $0x1b0] sm:$0xff]  ;;  %v242_v26 = vld [vmem:[#allocation5 + $0x1c8] sm:$0xff]  ;;  %v244_v27 = vld [vmem:[#allocation5 + $0x1d8] sm:$0xff] }
  0x71   :  { %v2352_v28 = vpack.c.bf16 %v239_v25, %v237_v24  ;;  %v2354_v29 = vpack.c.bf16 %v244_v27, %v242_v26  ;;  %v241_v30 = vld [vmem:[#allocation5 + $0x1c0] sm:$0xff]  ;;  %v243_v31 = vld [vmem:[#allocation5 + $0x1d0] sm:$0xff]  ;;  %v246_v32 = vld [vmem:[#allocation5 + $0x1e8] sm:$0xff] }
  0x72   :  { %v248_v33 = vld [vmem:[#allocation5 + $0x1f8] sm:$0xff]  ;;  %v2356_v34 = vpack.c.bf16 %v243_v31, %v241_v30  ;;  %v245_v36 = vld [vmem:[#allocation5 + $0x1e0] sm:$0xff]  ;;  %v247_v37 = vld [vmem:[#allocation5 + $0x1f0] sm:$0xff] }
  0x73   :  { %2321 = vmatpush1.bf16.msra.mxu0 %v2320_v38  ;;  %v2358_v35 = vpack.c.bf16 %v248_v33, %v246_v32  ;;  %v250_v38 = vld [vmem:[#allocation5 + $0x208] sm:$0xff]  ;;  %v2360_v40 = vpack.c.bf16 %v247_v37, %v245_v36  ;;  %v249_v42 = vld [vmem:[#allocation5 + $0x200] sm:$0xff]  ;;  %v251_v43 = vld [vmem:[#allocation5 + $0x210] sm:$0xff] }
  0x74   :  { %2323 = vmatprep.subr.bf16.mxu0 %v2322_v39  ;;  %v252_v39 = vld [vmem:[#allocation5 + $0x218] sm:$0xff]  ;;  %v254_v44 = vld [vmem:[#allocation5 + $0x228] sm:$0xff]  ;;  %v253_v50 = vld [vmem:[#allocation5 + $0x220] sm:$0xff] }
  0x75   :  { %v2362_v41 = vpack.c.bf16 %v252_v39, %v250_v38  ;;  %v3482_v48 = vld [vmem:[%s3937_s0 + $0x78] sm:$0xff]  ;;  %v255_v51 = vld [vmem:[#allocation5 + $0x230] sm:$0xff]  ;;  %v3492_v55 = vld [vmem:[%s3937_s0 + $0x28] sm:$0xff] }
  0x76   :  { %v260_v54 = vld [vmem:[#allocation5 + $0x258] sm:$0xff]  ;;  %v3498_v56 = vld [vmem:[%s3937_s0 + $0x20] sm:$0xff]  ;;  %v2368_v57 = vpack.c.bf16 %v255_v51, %v253_v50  ;;  %v259_v60 = vld [vmem:[#allocation5 + $0x250] sm:$0xff] }
  0x77   :  { %2325 = vmatpush1.bf16.msra.mxu0 %v2324_v46  ;;  %v256_v46 = vld [vmem:[#allocation5 + $0x238] sm:$0xff]  ;;  %v262_v61 = vld [vmem:[#allocation5 + $0x268] sm:$0xff]  ;;  %v273_v18 = vld [vmem:[#allocation5 + $0x2c0] sm:$0xff] }
  0x78   :  { %2327 = vmatprep.subr.bf16.mxu0 %v2326_v47  ;;  %v2364_v47 = vpack.c.bf16 %v251_v43, %v249_v42  ;;  %v2366_v49 = vpack.c.bf16 %v256_v46, %v254_v44  ;;  %v264_v62 = vld [vmem:[#allocation5 + $0x278] sm:$0xff]  ;;  %v266_v2 = vld [vmem:[#allocation5 + $0x288] sm:$0xff]  ;;  %v275_v20 = vld [vmem:[#allocation5 + $0x2d0] sm:$0xff] }
  0x79   :  { %v268_v3 = vld [vmem:[#allocation5 + $0x298] sm:$0xff]  ;;  %v270_v8 = vld [vmem:[#allocation5 + $0x2a8] sm:$0xff]  ;;  %v277_v25 = vld [vmem:[#allocation5 + $0x2e0] sm:$0xff] }
  0x7a   :  { %v2378_v5 = vpack.c.bf16 %v268_v3, %v266_v2  ;;  %v272_v9 = vld [vmem:[#allocation5 + $0x2b8] sm:$0xff]  ;;  %v278_v21 = vld [vmem:[#allocation5 + $0x2e8] sm:$0xff]  ;;  %v279_v26 = vld [vmem:[#allocation5 + $0x2f0] sm:$0xff] }
  0x7b   :  { %2329 = vmatpush1.bf16.msra.mxu0 %v2328_v52  ;;  %v3487_v52 = vld [vmem:[%s3937_s0 + $0x70] sm:$0xff]  ;;  %v2382_v11 = vpack.c.bf16 %v272_v9, %v270_v8  ;;  %v282_v27 = vld [vmem:[#allocation5 + $0x308] sm:$0xff]  ;;  %v281_v31 = vld [vmem:[#allocation5 + $0x300] sm:$0xff] }
  0x7c   :  { %2331 = vmatprep.subr.bf16.mxu0 %v2330_v53  ;;  %v258_v53 = vld [vmem:[#allocation5 + $0x248] sm:$0xff]  ;;  %v283_v32 = vld [vmem:[#allocation5 + $0x310] sm:$0xff]  ;;  %v285_v37 = vld [vmem:[#allocation5 + $0x320] sm:$0xff] }
  0x7d   :  { %v286_v33 = vld [vmem:[#allocation5 + $0x328] sm:$0xff]  ;;  %v287_v38 = vld [vmem:[#allocation5 + $0x330] sm:$0xff]  ;;  %v289_v43 = vld [vmem:[#allocation5 + $0x340] sm:$0xff] }
  0x7e   :  { %v290_v39 = vld [vmem:[#allocation5 + $0x348] sm:$0xff]  ;;  %v291_v44 = vld [vmem:[#allocation5 + $0x350] sm:$0xff]  ;;  %v293_v51 = vld [vmem:[#allocation5 + $0x360] sm:$0xff] }
  0x7f   :  { %2333 = vmatpush1.bf16.msra.mxu0 %v2332_v58  ;;  %v2370_v58 = vpack.c.bf16 %v260_v54, %v258_v53  ;;  %v294_v46 = vld [vmem:[#allocation5 + $0x368] sm:$0xff]  ;;  %v295_v53 = vld [vmem:[#allocation5 + $0x370] sm:$0xff] }
  0x80   :  { %2335 = vmatprep.subr.bf16.mxu0 %v2334_v59  ;;  %v257_v59 = vld [vmem:[#allocation5 + $0x240] sm:$0xff]  ;;  %v298_v54 = vld [vmem:[#allocation5 + $0x388] sm:$0xff]  ;;  %v303_v2 = vld [vmem:[#allocation5 + $0x3b0] sm:$0xff] }
  0x81   :  { %v2372_v63 = vpack.c.bf16 %v259_v60, %v257_v59  ;;  %v297_v60 = vld [vmem:[#allocation5 + $0x380] sm:$0xff]  ;;  %v306_v3 = vld [vmem:[#allocation5 + $0x3c8] sm:$0xff]  ;;  %v307_v8 = vld [vmem:[#allocation5 + $0x3d0] sm:$0xff] }
  0x82   :  { %v310_v9 = vld [vmem:[#allocation5 + $0x3e8] sm:$0xff] }
  0x83   :  { %2337 = vmatpush1.bf16.msra.mxu0 %v2336_v0  ;;  %v261_v0 = vld [vmem:[#allocation5 + $0x260] sm:$0xff] }
  0x84   :  { %2339 = vmatprep.subr.bf16.mxu0 %v2338_v1  ;;  %v263_v1 = vld [vmem:[#allocation5 + $0x270] sm:$0xff] }
  0x85   :  { %v2376_v4 = vpack.c.bf16 %v263_v1, %v261_v0  ;;  %v301_v1 = vld [vmem:[#allocation5 + $0x3a0] sm:$0xff] }
  0x87   :  { %2341 = vmatpush1.bf16.msra.mxu0 %v2340_v6  ;;  %v265_v6 = vld [vmem:[#allocation5 + $0x280] sm:$0xff] }
  0x88   :  { %2343 = vmatprep.subr.bf16.mxu0 %v2342_v7  ;;  %v267_v7 = vld [vmem:[#allocation5 + $0x290] sm:$0xff] }
  0x89   :  { %v2380_v10 = vpack.c.bf16 %v267_v7, %v265_v6  ;;  %v305_v7 = vld [vmem:[#allocation5 + $0x3c0] sm:$0xff] }
  0x8b   :  { %2345 = vmatpush1.bf16.msra.mxu0 %v2344_v14  ;;  %v274_v14 = vld [vmem:[#allocation5 + $0x2c8] sm:$0xff] }
  0x8c   :  { %2347 = vmatprep.subr.bf16.mxu0 %v2346_v16 }
  0x8f   :  { %2349 = vmatpush1.bf16.msra.mxu0 %v2348_v22  ;;  %v280_v22 = vld [vmem:[#allocation5 + $0x2f8] sm:$0xff] }
  0x90   :  { %2351 = vmatprep.subr.bf16.mxu0 %v2350_v23  ;;  %v2388_v23 = vpack.c.bf16 %v275_v20, %v273_v18  ;;  %v2390_v24 = vpack.c.bf16 %v280_v22, %v278_v21  ;;  %v3505_v18 = vld [vmem:[%s3937_s0 + $0x88] sm:$0xff]  ;;  %v313_v21 = vld [vmem:[#allocation5 + $0x400] sm:$0xff]  ;;  %v315_v22 = vld [vmem:[#allocation5 + $0x410] sm:$0xff] }
  0x93   :  { %2353 = vmatpush1.bf16.msra.mxu0 %v2352_v28  ;;  %v284_v28 = vld [vmem:[#allocation5 + $0x318] sm:$0xff] }
  0x94   :  { %2355 = vmatprep.subr.bf16.mxu0 %v2354_v29  ;;  %v2392_v29 = vpack.c.bf16 %v279_v26, %v277_v25  ;;  %v2394_v30 = vpack.c.bf16 %v284_v28, %v282_v27  ;;  %v320_v25 = vld [vmem:[#allocation5 + $0x438] sm:$0xff]  ;;  %v2428_v26 = vpack.c.bf16 %v315_v22, %v313_v21  ;;  %v353_v22 = vld [vmem:[#allocation5 + $0x540] sm:$0xff] }
  0x95   :  { %v3515_v27 = vld [vmem:[%s3937_s0 + $0x38] sm:$0xff] }
  0x97   :  { %2357 = vmatpush1.bf16.msra.mxu0 %v2356_v34  ;;  %v288_v34 = vld [vmem:[#allocation5 + $0x338] sm:$0xff] }
  0x98   :  { %2359 = vmatprep.subr.bf16.mxu0 %v2358_v35  ;;  %v2396_v35 = vpack.c.bf16 %v283_v32, %v281_v31  ;;  %v2398_v36 = vpack.c.bf16 %v288_v34, %v286_v33  ;;  %v3520_v31 = vld [vmem:[%s3937_s0 + $0x30] sm:$0xff]  ;;  %v322_v32 = vld [vmem:[#allocation5 + $0x448] sm:$0xff]  ;;  %v324_v33 = vld [vmem:[#allocation5 + $0x458] sm:$0xff] }
  0x9b   :  { %2361 = vmatpush1.bf16.msra.mxu0 %v2360_v40  ;;  %v292_v40 = vld [vmem:[#allocation5 + $0x358] sm:$0xff] }
  0x9c   :  { %2363 = vmatprep.subr.bf16.mxu0 %v2362_v41  ;;  %v2400_v41 = vpack.c.bf16 %v287_v38, %v285_v37  ;;  %v2402_v42 = vpack.c.bf16 %v292_v40, %v290_v39  ;;  %v323_v37 = vld [vmem:[#allocation5 + $0x450] sm:$0xff]  ;;  %v326_v38 = vld [vmem:[#allocation5 + $0x468] sm:$0xff]  ;;  %v328_v39 = vld [vmem:[#allocation5 + $0x478] sm:$0xff] }
  0x9e   :  { %646 = vmatmul.mubr.f32.vlgmr.msra.gmra.mrb[0].mxu0 %v3459_v45  ;;  %v2374_v45 = vpack.c.bf16 %v264_v62, %v262_v61  ;;  %v299_v61 = vld [vmem:[#allocation5 + $0x390] sm:$0xff]  ;;  %v302_v62 = vld [vmem:[#allocation5 + $0x3a8] sm:$0xff] }
  0x9f   :  { %2365 = vmatpush1.bf16.msra.mxu0 %v2364_v47  ;;  %651 = vmatprep.mubr.f32.mxu0 %v125_v12  ;;  %v269_v12 = vld [vmem:[#allocation5 + $0x2a0] sm:$0xff]  ;;  %v296_v47 = vld [vmem:[#allocation5 + $0x378] sm:$0xff] }
  0xa0   :  { %2367 = vmatprep.subr.bf16.mxu0 %v2366_v49  ;;  %v2404_v49 = vpack.c.bf16 %v291_v44, %v289_v43  ;;  %v2406_v50 = vpack.c.bf16 %v296_v47, %v294_v46  ;;  %v330_v43 = vld [vmem:[#allocation5 + $0x488] sm:$0xff]  ;;  %v332_v44 = vld [vmem:[#allocation5 + $0x498] sm:$0xff]  ;;  %v329_v47 = vld [vmem:[#allocation5 + $0x480] sm:$0xff] }
  0xa1   :  { %v2442_v46 = vpack.c.bf16 %v332_v44, %v330_v43  ;;  %v367_v43 = vld [vmem:[#allocation5 + $0x5b0] sm:$0xff]  ;;  %v370_v44 = vld [vmem:[#allocation5 + $0x5c8] sm:$0xff] }
  0xa2   :  { %652 = vmatmul.mubr.f32.gmra.mrb[2].mxu0 %v3467_v13  ;;  %v271_v13 = vld [vmem:[#allocation5 + $0x2b0] sm:$0xff] }
  0xa3   :  { %2369 = vmatpush1.bf16.msra.mxu0 %v2368_v57  ;;  %722 = vmatprep.mubr.f32.mxu0 %v3472_v15  ;;  %v276_v15 = vld [vmem:[#allocation5 + $0x2d8] sm:$0xff]  ;;  %v2384_v16 = vpack.c.bf16 %v271_v13, %v269_v12  ;;  %v309_v13 = vld [vmem:[#allocation5 + $0x3e0] sm:$0xff] }
  0xa4   :  { %2371 = vmatprep.subr.bf16.mxu0 %v2370_v58  ;;  %v2386_v17 = vpack.c.bf16 %v276_v15, %v274_v14  ;;  %v300_v57 = vld [vmem:[#allocation5 + $0x398] sm:$0xff]  ;;  %v2408_v58 = vpack.c.bf16 %v295_v53, %v293_v51  ;;  %v311_v14 = vld [vmem:[#allocation5 + $0x3f0] sm:$0xff]  ;;  %v314_v15 = vld [vmem:[#allocation5 + $0x408] sm:$0xff] }
  0xa5   :  { %v2410_v59 = vpack.c.bf16 %v300_v57, %v298_v54  ;;  %v336_v51 = vld [vmem:[#allocation5 + $0x4b8] sm:$0xff]  ;;  %v333_v54 = vld [vmem:[#allocation5 + $0x4a0] sm:$0xff]  ;;  %v338_v57 = vld [vmem:[#allocation5 + $0x4c8] sm:$0xff] }
  0xa7   :  { %2373 = vmatpush1.bf16.msra.mxu0 %v2372_v63  ;;  %v304_v63 = vld [vmem:[#allocation5 + $0x3b8] sm:$0xff] }
  0xa8   :  { %2375 = vmatprep.subr.bf16.mxu0 %v2374_v45  ;;  %v2412_v45 = vpack.c.bf16 %v299_v61, %v297_v60  ;;  %v2414_v0 = vpack.c.bf16 %v304_v63, %v302_v62  ;;  %v337_v61 = vld [vmem:[#allocation5 + $0x4c0] sm:$0xff]  ;;  %v339_v62 = vld [vmem:[#allocation5 + $0x4d0] sm:$0xff]  ;;  %v342_v63 = vld [vmem:[#allocation5 + $0x4e8] sm:$0xff] }
  0xab   :  { %2377 = vmatpush1.bf16.msra.mxu0 %v2376_v4  ;;  %v308_v4 = vld [vmem:[#allocation5 + $0x3d8] sm:$0xff] }
  0xac   :  { %2379 = vmatprep.subr.bf16.mxu0 %v2378_v5  ;;  %v2416_v5 = vpack.c.bf16 %v303_v2, %v301_v1  ;;  %v2418_v6 = vpack.c.bf16 %v308_v4, %v306_v3  ;;  %v341_v2 = vld [vmem:[#allocation5 + $0x4e0] sm:$0xff]  ;;  %v343_v3 = vld [vmem:[#allocation5 + $0x4f0] sm:$0xff]  ;;  %v346_v4 = vld [vmem:[#allocation5 + $0x508] sm:$0xff] }
  0xaf   :  { %2381 = vmatpush1.bf16.msra.mxu0 %v2380_v10  ;;  %v312_v10 = vld [vmem:[#allocation5 + $0x3f8] sm:$0xff] }
  0xb0   :  { %2383 = vmatprep.subr.bf16.mxu0 %v2382_v11  ;;  %v2420_v11 = vpack.c.bf16 %v307_v8, %v305_v7  ;;  %v2422_v12 = vpack.c.bf16 %v312_v10, %v310_v9  ;;  %v345_v8 = vld [vmem:[#allocation5 + $0x500] sm:$0xff]  ;;  %v347_v9 = vld [vmem:[#allocation5 + $0x510] sm:$0xff]  ;;  %v350_v10 = vld [vmem:[#allocation5 + $0x528] sm:$0xff] }
  0xb3   :  { %2385 = vmatpush1.bf16.msra.mxu0 %v2384_v16  ;;  %v316_v16 = vld [vmem:[#allocation5 + $0x418] sm:$0xff] }
  0xb4   :  { %2387 = vmatprep.subr.bf16.mxu0 %v2386_v17  ;;  %v2424_v17 = vpack.c.bf16 %v311_v14, %v309_v13  ;;  %v2426_v20 = vpack.c.bf16 %v316_v16, %v314_v15  ;;  %v349_v14 = vld [vmem:[#allocation5 + $0x520] sm:$0xff]  ;;  %v351_v15 = vld [vmem:[#allocation5 + $0x530] sm:$0xff]  ;;  %v354_v16 = vld [vmem:[#allocation5 + $0x548] sm:$0xff] }
  0xb7   :  { %2389 = vmatpush1.bf16.msra.mxu0 %v2388_v23  ;;  %v3510_v23 = vld [vmem:[%s3937_s0 + $0x80] sm:$0xff] }
  0xb8   :  { %2391 = vmatprep.subr.bf16.mxu0 %v2390_v24  ;;  %v318_v24 = vld [vmem:[#allocation5 + $0x428] sm:$0xff] }
  0xb9   :  { %v2430_v28 = vpack.c.bf16 %v320_v25, %v318_v24  ;;  %v355_v24 = vld [vmem:[#allocation5 + $0x550] sm:$0xff]  ;;  %v358_v25 = vld [vmem:[#allocation5 + $0x568] sm:$0xff] }
  0xbb   :  { %2393 = vmatpush1.bf16.msra.mxu0 %v2392_v29  ;;  %v317_v29 = vld [vmem:[#allocation5 + $0x420] sm:$0xff] }
  0xbc   :  { %2395 = vmatprep.subr.bf16.mxu0 %v2394_v30  ;;  %v319_v30 = vld [vmem:[#allocation5 + $0x430] sm:$0xff] }
  0xbd   :  { %v2432_v34 = vpack.c.bf16 %v319_v30, %v317_v29  ;;  %v357_v30 = vld [vmem:[#allocation5 + $0x560] sm:$0xff] }
  0xbf   :  { %2397 = vmatpush1.bf16.msra.mxu0 %v2396_v35  ;;  %v2434_v35 = vpack.c.bf16 %v324_v33, %v322_v32  ;;  %v359_v32 = vld [vmem:[#allocation5 + $0x570] sm:$0xff]  ;;  %v362_v33 = vld [vmem:[#allocation5 + $0x588] sm:$0xff] }
  0xc0   :  { %2399 = vmatprep.subr.bf16.mxu0 %v2398_v36  ;;  %v321_v36 = vld [vmem:[#allocation5 + $0x440] sm:$0xff] }
  0xc1   :  { %v2436_v40 = vpack.c.bf16 %v323_v37, %v321_v36  ;;  %v361_v37 = vld [vmem:[#allocation5 + $0x580] sm:$0xff] }
  0xc3   :  { %2401 = vmatpush1.bf16.msra.mxu0 %v2400_v41  ;;  %v2438_v41 = vpack.c.bf16 %v328_v39, %v326_v38  ;;  %v363_v38 = vld [vmem:[#allocation5 + $0x590] sm:$0xff]  ;;  %v366_v39 = vld [vmem:[#allocation5 + $0x5a8] sm:$0xff] }
  0xc4   :  { %2403 = vmatprep.subr.bf16.mxu0 %v2402_v42  ;;  %v325_v42 = vld [vmem:[#allocation5 + $0x460] sm:$0xff] }
  0xc7   :  { %2405 = vmatpush1.bf16.msra.mxu0 %v2404_v49  ;;  %v331_v49 = vld [vmem:[#allocation5 + $0x490] sm:$0xff] }
  0xc8   :  { %2407 = vmatprep.subr.bf16.mxu0 %v2406_v50  ;;  %v334_v50 = vld [vmem:[#allocation5 + $0x4a8] sm:$0xff] }
  0xc9   :  { %v2446_v53 = vpack.c.bf16 %v336_v51, %v334_v50  ;;  %v371_v50 = vld [vmem:[#allocation5 + $0x5d0] sm:$0xff]  ;;  %v374_v51 = vld [vmem:[#allocation5 + $0x5e8] sm:$0xff] }
  0xcb   :  { %2409 = vmatpush1.bf16.msra.mxu0 %v2408_v58  ;;  %v340_v58 = vld [vmem:[#allocation5 + $0x4d8] sm:$0xff] }
  0xcc   :  { %2411 = vmatprep.subr.bf16.mxu0 %v2410_v59  ;;  %v2450_v60 = vpack.c.bf16 %v340_v58, %v338_v57  ;;  %v375_v57 = vld [vmem:[#allocation5 + $0x5f0] sm:$0xff]  ;;  %v378_v58 = vld [vmem:[#allocation5 + $0x608] sm:$0xff] }
  0xcf   :  { %2413 = vmatpush1.bf16.msra.mxu0 %v2412_v45  ;;  %v344_v45 = vld [vmem:[#allocation5 + $0x4f8] sm:$0xff] }
  0xd0   :  { %2415 = vmatprep.subr.bf16.mxu0 %v2414_v0  ;;  %v2452_v0 = vpack.c.bf16 %v339_v62, %v337_v61  ;;  %v2454_v1 = vpack.c.bf16 %v344_v45, %v342_v63  ;;  %v3529_v61 = vld [vmem:[%s3937_s0 + $0x98] sm:$0xff]  ;;  %v377_v63 = vld [vmem:[#allocation5 + $0x600] sm:$0xff]  ;;  %v379_v45 = vld [vmem:[#allocation5 + $0x610] sm:$0xff] }
  0xd3   :  { %2417 = vmatpush1.bf16.msra.mxu0 %v2416_v5  ;;  %v348_v5 = vld [vmem:[#allocation5 + $0x518] sm:$0xff] }
  0xd4   :  { %2419 = vmatprep.subr.bf16.mxu0 %v2418_v6  ;;  %v2456_v6 = vpack.c.bf16 %v343_v3, %v341_v2  ;;  %v2458_v7 = vpack.c.bf16 %v348_v5, %v346_v4  ;;  %v384_v2 = vld [vmem:[#allocation5 + $0x638] sm:$0xff]  ;;  %v2492_v3 = vpack.c.bf16 %v379_v45, %v377_v63  ;;  %v3539_v4 = vld [vmem:[%s3937_s0 + $0x48] sm:$0xff]  ;;  %v417_v45 = vld [vmem:[#allocation5 + $0x740] sm:$0xff] }
  0xd7   :  { %2421 = vmatpush1.bf16.msra.mxu0 %v2420_v11  ;;  %v352_v11 = vld [vmem:[#allocation5 + $0x538] sm:$0xff] }
  0xd8   :  { %2423 = vmatprep.subr.bf16.mxu0 %v2422_v12  ;;  %v2460_v12 = vpack.c.bf16 %v347_v9, %v345_v8  ;;  %v2462_v13 = vpack.c.bf16 %v352_v11, %v350_v10  ;;  %v3544_v8 = vld [vmem:[%s3937_s0 + $0x40] sm:$0xff]  ;;  %v386_v9 = vld [vmem:[#allocation5 + $0x648] sm:$0xff]  ;;  %v388_v10 = vld [vmem:[#allocation5 + $0x658] sm:$0xff] }
  0xdb   :  { %2425 = vmatpush1.bf16.msra.mxu0 %v2424_v17  ;;  %v356_v17 = vld [vmem:[#allocation5 + $0x558] sm:$0xff] }
  0xdc   :  { %2427 = vmatprep.subr.bf16.mxu0 %v2426_v20  ;;  %v2464_v20 = vpack.c.bf16 %v351_v15, %v349_v14  ;;  %v2466_v21 = vpack.c.bf16 %v356_v17, %v354_v16  ;;  %v387_v14 = vld [vmem:[#allocation5 + $0x650] sm:$0xff]  ;;  %v390_v15 = vld [vmem:[#allocation5 + $0x668] sm:$0xff]  ;;  %v392_v16 = vld [vmem:[#allocation5 + $0x678] sm:$0xff] }
  0xde   :  { %723 = vmatmul.mubr.f32.vlgmr.msra.gmra.mrb[0].mxu0 %v3477_v19  ;;  %v327_v19 = vld [vmem:[#allocation5 + $0x470] sm:$0xff] }
  0xdf   :  { %2429 = vmatpush1.bf16.msra.mxu0 %v2428_v26  ;;  %728 = vmatprep.mubr.f32.mxu0 %v3482_v48  ;;  %v2440_v48 = vpack.c.bf16 %v327_v19, %v325_v42  ;;  %v360_v26 = vld [vmem:[#allocation5 + $0x578] sm:$0xff]  ;;  %v365_v19 = vld [vmem:[#allocation5 + $0x5a0] sm:$0xff] }
  0xe0   :  { %2431 = vmatprep.subr.bf16.mxu0 %v2430_v28  ;;  %v2468_v28 = vpack.c.bf16 %v355_v24, %v353_v22  ;;  %v2470_v29 = vpack.c.bf16 %v360_v26, %v358_v25  ;;  %v394_v22 = vld [vmem:[#allocation5 + $0x688] sm:$0xff]  ;;  %v396_v24 = vld [vmem:[#allocation5 + $0x698] sm:$0xff]  ;;  %v393_v26 = vld [vmem:[#allocation5 + $0x680] sm:$0xff] }
  0xe1   :  { %v2506_v25 = vpack.c.bf16 %v396_v24, %v394_v22  ;;  %v431_v22 = vld [vmem:[#allocation5 + $0x7b0] sm:$0xff]  ;;  %v434_v24 = vld [vmem:[#allocation5 + $0x7c8] sm:$0xff] }
  0xe2   :  { %729 = vmatmul.mubr.f32.gmra.mrb[2].mxu0 %v3487_v52  ;;  %v2444_v52 = vpack.c.bf16 %v331_v49, %v329_v47  ;;  %v369_v49 = vld [vmem:[#allocation5 + $0x5c0] sm:$0xff] }
  0xe3   :  { %2433 = vmatpush1.bf16.msra.mxu0 %v2432_v34  ;;  %799 = vmatprep.mubr.f32.mxu0 %v3492_v55  ;;  %v335_v55 = vld [vmem:[#allocation5 + $0x4b0] sm:$0xff]  ;;  %v364_v34 = vld [vmem:[#allocation5 + $0x598] sm:$0xff] }
  0xe4   :  { %2435 = vmatprep.subr.bf16.mxu0 %v2434_v35  ;;  %v2448_v59 = vpack.c.bf16 %v335_v55, %v333_v54  ;;  %v2472_v35 = vpack.c.bf16 %v359_v32, %v357_v30  ;;  %v2474_v36 = vpack.c.bf16 %v364_v34, %v362_v33  ;;  %v373_v55 = vld [vmem:[#allocation5 + $0x5e0] sm:$0xff]  ;;  %v400_v30 = vld [vmem:[#allocation5 + $0x6b8] sm:$0xff]  ;;  %v402_v34 = vld [vmem:[#allocation5 + $0x6c8] sm:$0xff] }
  0xe5   :  { %v397_v33 = vld [vmem:[#allocation5 + $0x6a0] sm:$0xff] }
  0xe7   :  { %2437 = vmatpush1.bf16.msra.mxu0 %v2436_v40  ;;  %v368_v40 = vld [vmem:[#allocation5 + $0x5b8] sm:$0xff] }
  0xe8   :  { %2439 = vmatprep.subr.bf16.mxu0 %v2438_v41  ;;  %v2476_v41 = vpack.c.bf16 %v363_v38, %v361_v37  ;;  %v2478_v42 = vpack.c.bf16 %v368_v40, %v366_v39  ;;  %v401_v38 = vld [vmem:[#allocation5 + $0x6c0] sm:$0xff]  ;;  %v403_v39 = vld [vmem:[#allocation5 + $0x6d0] sm:$0xff]  ;;  %v406_v40 = vld [vmem:[#allocation5 + $0x6e8] sm:$0xff] }
  0xeb   :  { %2441 = vmatpush1.bf16.msra.mxu0 %v2440_v48  ;;  %v372_v48 = vld [vmem:[#allocation5 + $0x5d8] sm:$0xff] }
  0xec   :  { %2443 = vmatprep.subr.bf16.mxu0 %v2442_v46  ;;  %v2480_v46 = vpack.c.bf16 %v367_v43, %v365_v19  ;;  %v2482_v47 = vpack.c.bf16 %v372_v48, %v370_v44  ;;  %v405_v43 = vld [vmem:[#allocation5 + $0x6e0] sm:$0xff]  ;;  %v407_v44 = vld [vmem:[#allocation5 + $0x6f0] sm:$0xff]  ;;  %v410_v48 = vld [vmem:[#allocation5 + $0x708] sm:$0xff] }
  0xef   :  { %2445 = vmatpush1.bf16.msra.mxu0 %v2444_v52  ;;  %v376_v52 = vld [vmem:[#allocation5 + $0x5f8] sm:$0xff] }
  0xf0   :  { %2447 = vmatprep.subr.bf16.mxu0 %v2446_v53  ;;  %v2484_v53 = vpack.c.bf16 %v371_v50, %v369_v49  ;;  %v2486_v54 = vpack.c.bf16 %v376_v52, %v374_v51  ;;  %v409_v50 = vld [vmem:[#allocation5 + $0x700] sm:$0xff]  ;;  %v411_v51 = vld [vmem:[#allocation5 + $0x710] sm:$0xff]  ;;  %v414_v52 = vld [vmem:[#allocation5 + $0x728] sm:$0xff] }
  0xf3   :  { %2449 = vmatpush1.bf16.msra.mxu0 %v2448_v59  ;;  %v380_v59 = vld [vmem:[#allocation5 + $0x618] sm:$0xff] }
  0xf4   :  { %2451 = vmatprep.subr.bf16.mxu0 %v2450_v60  ;;  %v2488_v60 = vpack.c.bf16 %v375_v57, %v373_v55  ;;  %v2490_v62 = vpack.c.bf16 %v380_v59, %v378_v58  ;;  %v413_v57 = vld [vmem:[#allocation5 + $0x720] sm:$0xff]  ;;  %v415_v58 = vld [vmem:[#allocation5 + $0x730] sm:$0xff]  ;;  %v418_v59 = vld [vmem:[#allocation5 + $0x748] sm:$0xff] }
  0xf7   :  { %2453 = vmatpush1.bf16.msra.mxu0 %v2452_v0  ;;  %v3534_v0 = vld [vmem:[%s3937_s0 + $0x90] sm:$0xff] }
  0xf8   :  { %2455 = vmatprep.subr.bf16.mxu0 %v2454_v1  ;;  %v382_v1 = vld [vmem:[#allocation5 + $0x628] sm:$0xff] }
  0xf9   :  { %v2494_v5 = vpack.c.bf16 %v384_v2, %v382_v1  ;;  %v419_v1 = vld [vmem:[#allocation5 + $0x750] sm:$0xff]  ;;  %v422_v2 = vld [vmem:[#allocation5 + $0x768] sm:$0xff] }
  0xfb   :  { %2457 = vmatpush1.bf16.msra.mxu0 %v2456_v6  ;;  %v381_v6 = vld [vmem:[#allocation5 + $0x620] sm:$0xff] }
  0xfc   :  { %2459 = vmatprep.subr.bf16.mxu0 %v2458_v7  ;;  %v383_v7 = vld [vmem:[#allocation5 + $0x630] sm:$0xff] }
  0xfd   :  { %v2496_v11 = vpack.c.bf16 %v383_v7, %v381_v6  ;;  %v421_v7 = vld [vmem:[#allocation5 + $0x760] sm:$0xff] }
  0xff   :  { %2461 = vmatpush1.bf16.msra.mxu0 %v2460_v12  ;;  %v2498_v12 = vpack.c.bf16 %v388_v10, %v386_v9  ;;  %v423_v9 = vld [vmem:[#allocation5 + $0x770] sm:$0xff]  ;;  %v426_v10 = vld [vmem:[#allocation5 + $0x788] sm:$0xff] }
 0x100   :  { %2463 = vmatprep.subr.bf16.mxu0 %v2462_v13  ;;  %v385_v13 = vld [vmem:[#allocation5 + $0x640] sm:$0xff] }
 0x101   :  { %v2500_v17 = vpack.c.bf16 %v387_v14, %v385_v13  ;;  %v425_v14 = vld [vmem:[#allocation5 + $0x780] sm:$0xff] }
 0x103   :  { %2465 = vmatpush1.bf16.msra.mxu0 %v2464_v20  ;;  %v2502_v20 = vpack.c.bf16 %v392_v16, %v390_v15  ;;  %v427_v15 = vld [vmem:[#allocation5 + $0x790] sm:$0xff]  ;;  %v430_v16 = vld [vmem:[#allocation5 + $0x7a8] sm:$0xff] }
 0x104   :  { %2467 = vmatprep.subr.bf16.mxu0 %v2466_v21  ;;  %v389_v21 = vld [vmem:[#allocation5 + $0x660] sm:$0xff] }
 0x107   :  { %2469 = vmatpush1.bf16.msra.mxu0 %v2468_v28  ;;  %v395_v28 = vld [vmem:[#allocation5 + $0x690] sm:$0xff] }
 0x108   :  { %2471 = vmatprep.subr.bf16.mxu0 %v2470_v29  ;;  %v398_v29 = vld [vmem:[#allocation5 + $0x6a8] sm:$0xff] }
 0x109   :  { %v2510_v32 = vpack.c.bf16 %v400_v30, %v398_v29  ;;  %v435_v29 = vld [vmem:[#allocation5 + $0x7d0] sm:$0xff]  ;;  %v438_v30 = vld [vmem:[#allocation5 + $0x7e8] sm:$0xff] }
 0x10b   :  { %2473 = vmatpush1.bf16.msra.mxu0 %v2472_v35  ;;  %v404_v35 = vld [vmem:[#allocation5 + $0x6d8] sm:$0xff] }
 0x10c   :  { %2475 = vmatprep.subr.bf16.mxu0 %v2474_v36  ;;  %v2514_v37 = vpack.c.bf16 %v404_v35, %v402_v34  ;;  %v439_v34 = vld [vmem:[#allocation5 + $0x7f0] sm:$0xff]  ;;  %v123_v35 = vld [vmem:[%s3937_s0 + $0x58] sm:$0xff] }
 0x10d   :  { %148 = vst.msk [vmem:[#allocation2 + $0x58] sm:$0xff] %vm147_vm0, %v123_v35 }
 0x10f   :  { %2477 = vmatpush1.bf16.msra.mxu0 %v2476_v41  ;;  %v408_v41 = vld [vmem:[#allocation5 + $0x6f8] sm:$0xff] }
 0x110   :  { %2479 = vmatprep.subr.bf16.mxu0 %v2478_v42  ;;  %v2516_v42 = vpack.c.bf16 %v403_v39, %v401_v38  ;;  %v2518_v19 = vpack.c.bf16 %v408_v41, %v406_v40  ;;  %v3556_v39 = vld [vmem:[%s3937_s0 + $0xa8] sm:$0xff]  ;;  %v3561_v40 = vld [vmem:[%s3937_s0 + $0xa0] sm:$0xff] }
 0x113   :  { %2481 = vmatpush1.bf16.msra.mxu0 %v2480_v46  ;;  %v412_v46 = vld [vmem:[#allocation5 + $0x718] sm:$0xff] }
 0x114   :  { %2483 = vmatprep.subr.bf16.mxu0 %v2482_v47  ;;  %v2520_v47 = vpack.c.bf16 %v407_v44, %v405_v43  ;;  %v2522_v49 = vpack.c.bf16 %v412_v46, %v410_v48  ;;  %v446_v43 = vld [vmem:[#allocation5 + $0x828] sm:$0xff]  ;;  %v448_v44 = vld [vmem:[#allocation5 + $0x838] sm:$0xff] }
 0x115   :  { %v135_v48 = vld [vmem:[%s3937_s0 + $0xb8] sm:$0xff] }
 0x116   :  { %160 = vst.msk [vmem:[#allocation2 + $0xb8] sm:$0xff] %vm147_vm0, %v135_v48 }
 0x117   :  { %2485 = vmatpush1.bf16.msra.mxu0 %v2484_v53  ;;  %v416_v53 = vld [vmem:[#allocation5 + $0x738] sm:$0xff] }
 0x118   :  { %2487 = vmatprep.subr.bf16.mxu0 %v2486_v54  ;;  %v2524_v54 = vpack.c.bf16 %v411_v51, %v409_v50  ;;  %v2526_v55 = vpack.c.bf16 %v416_v53, %v414_v52  ;;  %v445_v50 = vld [vmem:[#allocation5 + $0x820] sm:$0xff]  ;;  %v447_v51 = vld [vmem:[#allocation5 + $0x830] sm:$0xff]  ;;  %v450_v52 = vld [vmem:[#allocation5 + $0x848] sm:$0xff] }
 0x119   :  { %v452_v53 = vld [vmem:[#allocation5 + $0x858] sm:$0xff] }
 0x11b   :  { %2489 = vmatpush1.bf16.msra.mxu0 %v2488_v60  ;;  %v420_v60 = vld [vmem:[#allocation5 + $0x758] sm:$0xff] }
 0x11c   :  { %2491 = vmatprep.subr.bf16.mxu0 %v2490_v62  ;;  %v2528_v62 = vpack.c.bf16 %v415_v58, %v413_v57  ;;  %v2530_v63 = vpack.c.bf16 %v420_v60, %v418_v59  ;;  %v2562_v57 = vpack.c.bf16 %v452_v53, %v450_v52  ;;  %v449_v58 = vld [vmem:[#allocation5 + $0x840] sm:$0xff]  ;;  %v451_v59 = vld [vmem:[#allocation5 + $0x850] sm:$0xff]  ;;  %v454_v60 = vld [vmem:[#allocation5 + $0x868] sm:$0xff] }
 0x11d   :  { %v1076_v52 = vld [vmem:[#allocation10 + $0xa8] sm:$0xff]  ;;  %v1078_v53 = vld [vmem:[#allocation10 + $0xb8] sm:$0xff] }
 0x11e   :  { %800 = vmatmul.mubr.f32.vlgmr.msra.gmra.mrb[0].mxu0 %v3498_v56  ;;  %v391_v56 = vld [vmem:[#allocation5 + $0x670] sm:$0xff] }
 0x11f   :  { %2493 = vmatpush1.bf16.msra.mxu0 %v2492_v3  ;;  %805 = vmatprep.mubr.f32.mxu0 %v3505_v18  ;;  %v2504_v18 = vpack.c.bf16 %v391_v56, %v389_v21  ;;  %v424_v3 = vld [vmem:[#allocation5 + $0x778] sm:$0xff]  ;;  %v429_v56 = vld [vmem:[#allocation5 + $0x7a0] sm:$0xff] }
 0x120   :  { %2495 = vmatprep.subr.bf16.mxu0 %v2494_v5  ;;  %v2532_v5 = vpack.c.bf16 %v419_v1, %v417_v45  ;;  %v2534_v6 = vpack.c.bf16 %v424_v3, %v422_v2  ;;  %v455_v45 = vld [vmem:[#allocation5 + $0x870] sm:$0xff]  ;;  %v1058_v1 = vld [vmem:[#allocation10 + $0x18] sm:$0xff]  ;;  %v1055_v2 = vld [vmem:[#allocation10] sm:$0xff] }
 0x122   :  { %806 = vmatmul.mubr.f32.gmra.mrb[2].mxu0 %v3510_v23  ;;  %v2508_v23 = vpack.c.bf16 %v395_v28, %v393_v26  ;;  %v433_v28 = vld [vmem:[#allocation5 + $0x7c0] sm:$0xff] }
 0x123   :  { %2497 = vmatpush1.bf16.msra.mxu0 %v2496_v11  ;;  %876 = vmatprep.mubr.f32.mxu0 %v3515_v27  ;;  %v399_v27 = vld [vmem:[#allocation5 + $0x6b0] sm:$0xff]  ;;  %v428_v11 = vld [vmem:[#allocation5 + $0x798] sm:$0xff] }
 0x124   :  { %2499 = vmatprep.subr.bf16.mxu0 %v2498_v12  ;;  %v2512_v36 = vpack.c.bf16 %v399_v27, %v397_v33  ;;  %v2536_v12 = vpack.c.bf16 %v423_v9, %v421_v7  ;;  %v2538_v13 = vpack.c.bf16 %v428_v11, %v426_v10  ;;  %v437_v27 = vld [vmem:[#allocation5 + $0x7e0] sm:$0xff] }
 0x125   :  { %v2552_v38 = vpack.c.bf16 %v439_v34, %v437_v27  ;;  %v1062_v7 = vld [vmem:[#allocation10 + $0x38] sm:$0xff]  ;;  %v1067_v27 = vld [vmem:[#allocation10 + $0x60] sm:$0xff]  ;;  %v1069_v34 = vld [vmem:[#allocation10 + $0x70] sm:$0xff] }
 0x127   :  { %2501 = vmatpush1.bf16.msra.mxu0 %v2500_v17  ;;  %v432_v17 = vld [vmem:[#allocation5 + $0x7b8] sm:$0xff] }
 0x128   :  { %2503 = vmatprep.subr.bf16.mxu0 %v2502_v20  ;;  %v2540_v20 = vpack.c.bf16 %v427_v15, %v425_v14  ;;  %v2542_v21 = vpack.c.bf16 %v432_v17, %v430_v16  ;;  %v458_v14 = vld [vmem:[#allocation5 + $0x888] sm:$0xff]  ;;  %v460_v15 = vld [vmem:[#allocation5 + $0x898] sm:$0xff] }
 0x129   :  { %v1066_v16 = vld [vmem:[#allocation10 + $0x58] sm:$0xff] }
 0x12b   :  { %2505 = vmatpush1.bf16.msra.mxu0 %v2504_v18  ;;  %v436_v18 = vld [vmem:[#allocation5 + $0x7d8] sm:$0xff] }
 0x12c   :  { %2507 = vmatprep.subr.bf16.mxu0 %v2506_v25  ;;  %v2544_v25 = vpack.c.bf16 %v431_v22, %v429_v56  ;;  %v2546_v26 = vpack.c.bf16 %v436_v18, %v434_v24  ;;  %v1063_v56 = vld [vmem:[#allocation10 + $0x40] sm:$0xff]  ;;  %v1065_v22 = vld [vmem:[#allocation10 + $0x50] sm:$0xff]  ;;  %v2570_v24 = vpack.c.bf16 %v460_v15, %v458_v14 }
 0x12d   :  { %v459_v18 = vld [vmem:[#allocation5 + $0x890] sm:$0xff] }
 0x12e   :  { %v1081_v14 = vld [vmem:[#allocation10 + $0xd0] sm:$0xff] }
 0x12f   :  { %2509 = vmatpush1.bf16.msra.mxu0 %v2508_v23  ;;  %v440_v23 = vld [vmem:[#allocation5 + $0x7f8] sm:$0xff] }
 0x130   :  { %2511 = vmatprep.subr.bf16.mxu0 %v2510_v32  ;;  %v2548_v32 = vpack.c.bf16 %v435_v29, %v433_v28  ;;  %v2550_v33 = vpack.c.bf16 %v440_v23, %v438_v30  ;;  %v462_v28 = vld [vmem:[#allocation5 + $0x8a8] sm:$0xff]  ;;  %v464_v29 = vld [vmem:[#allocation5 + $0x8b8] sm:$0xff]  ;;  %v3594_v30 = vpack.c.bf16 %v1065_v22, %v1063_v56 }
 0x131   :  { %v2574_v35 = vpack.c.bf16 %v464_v29, %v462_v28  ;;  %v478_v56 = vld [vmem:[#allocation5 + $0x928] sm:$0xff]  ;;  %v480_v22 = vld [vmem:[#allocation5 + $0x938] sm:$0xff] }
 0x132   :  { %v1083_v28 = vld [vmem:[#allocation10 + $0xe0] sm:$0xff]  ;;  %v1085_v29 = vld [vmem:[#allocation10 + $0xf0] sm:$0xff] }
 0x133   :  { %2513 = vmatpush1.bf16.msra.mxu0 %v2512_v36  ;;  %v442_v36 = vld [vmem:[#allocation5 + $0x808] sm:$0xff] }
 0x134   :  { %2515 = vmatprep.subr.bf16.mxu0 %v2514_v37  ;;  %v444_v37 = vld [vmem:[#allocation5 + $0x818] sm:$0xff] }
 0x135   :  { %v2554_v41 = vpack.c.bf16 %v444_v37, %v442_v36  ;;  %v463_v36 = vld [vmem:[#allocation5 + $0x8b0] sm:$0xff] }
 0x136   :  { %v1072_v37 = vld [vmem:[#allocation10 + $0x88] sm:$0xff] }
 0x137   :  { %2517 = vmatpush1.bf16.msra.mxu0 %v2516_v42  ;;  %v441_v42 = vld [vmem:[#allocation5 + $0x800] sm:$0xff] }
 0x138   :  { %2519 = vmatprep.subr.bf16.mxu0 %v2518_v19  ;;  %v443_v19 = vld [vmem:[#allocation5 + $0x810] sm:$0xff] }
 0x139   :  { %v2556_v46 = vpack.c.bf16 %v443_v19, %v441_v42  ;;  %v468_v42 = vld [vmem:[#allocation5 + $0x8d8] sm:$0xff]  ;;  %v3600_v19 = vpack.c.bf16 %v1069_v34, %v1067_v27  ;;  %v1088_v27 = vld [vmem:[#allocation10 + $0x108] sm:$0xff] }
 0x13a   :  { %v1090_v34 = vld [vmem:[#allocation10 + $0x118] sm:$0xff] }
 0x13b   :  { %2521 = vmatpush1.bf16.msra.mxu0 %v2520_v47  ;;  %v3569_v47 = vld [vmem:[%s3937_s0 + $0x50] sm:$0xff] }
 0x13c   :  { %2523 = vmatprep.subr.bf16.mxu0 %v2522_v49  ;;  %v2558_v49 = vpack.c.bf16 %v448_v44, %v446_v43  ;;  %v465_v44 = vld [vmem:[#allocation5 + $0x8c0] sm:$0xff] }
 0x13f   :  { %2525 = vmatpush1.bf16.msra.mxu0 %v2524_v54  ;;  %v2560_v54 = vpack.c.bf16 %v447_v51, %v445_v50  ;;  %v467_v51 = vld [vmem:[#allocation5 + $0x8d0] sm:$0xff] }
 0x140   :  { %2527 = vmatprep.subr.bf16.mxu0 %v2526_v55  ;;  %v3576_v55 = vld [vmem:[%s3937_s0 + $0xb0] sm:$0xff]  ;;  %s3347_s0 = smov [#allocation14]  }
 0x141   :  { %s2245_s7 = sshll.u32 %s3347_s0, 4  ;;  %s2246_s7 = int_to_ptr.vmem [resolvable:$true] %s2245_s7 }
 0x142   :  { %s3307_s8 = scalar_lea.vmem %s2246_s7, 256  ;;  %p3312_p13 = scmp.lt.s32.totalorder %s2246_s7, %s2246_s7 }
 0x143   :  { %2529 = vmatpush1.bf16.msra.mxu0 %v2528_v62  ;;  %v456_v62 = vld [vmem:[#allocation5 + $0x878] sm:$0xff]  ;;  %p3308_p12 = scmp.ne.s32.totalorder %s2246_s7, %s3307_s8  ;;  %p3313_p0 = scmp.lt.s32.totalorder %s3307_s8, %s3307_s8 }
 0x144   :  { %2531 = vmatprep.subr.bf16.mxu0 %v2530_v63  ;;  %v453_v63 = vld [vmem:[#allocation5 + $0x860] sm:$0xff]  ;;  %v2566_v9 = vpack.c.bf16 %v456_v62, %v454_v60  ;;  %v3609_v62 = vpack.c.bf16 %v1078_v53, %v1076_v52  ;;  %v486_v52 = vld [vmem:[#allocation5 + $0x968] sm:$0xff]  ;;  %v488_v53 = vld [vmem:[#allocation5 + $0x978] sm:$0xff] }
 0x145   :  { %v2568_v17 = vpack.c.bf16 %v455_v45, %v453_v63  ;;  %v469_v60 = vld [vmem:[#allocation5 + $0x8e0] sm:$0xff]  ;;  %v1077_v45 = vld [vmem:[#allocation10 + $0xb0] sm:$0xff]  ;;  %p3314_p1 = por %p3313_p0, %p3312_p13 }
 0x146   :  { %v1075_v63 = vld [vmem:[#allocation10 + $0xa0] sm:$0xff] }
 0x147   :  { %2533 = vmatpush1.bf16.msra.mxu0 %v2532_v5  ;;  %v1057_v5 = vld [vmem:[#allocation10 + $0x10] sm:$0xff]  ;;  %p3315_p2 = pnand %p3314_p1, %p3308_p12 }
 0x148   :  { %2535 = vmatprep.subr.bf16.mxu0 %v2534_v6  ;;  %v1060_v6 = vld [vmem:[#allocation10 + $0x28] sm:$0xff]  ;;  %v3582_v10 = vpack.c.bf16 %v1057_v5, %v1055_v2 }
 0x149   :  { %v3584_v11 = vpack.c.bf16 %v1062_v7, %v1060_v6  ;;  %v1080_v2 = vld [vmem:[#allocation10 + $0xc8] sm:$0xff]  ;;  %v476_v6 = vld [vmem:[#allocation5 + $0x918] sm:$0xff]  ;;  %v3612_v7 = vpack.c.bf16 %v1077_v45, %v1075_v63  ;;  %v1091_v63 = vld [vmem:[#allocation10 + $0x120] sm:$0xff] }
 0x14a   :  { %v474_v5 = vld [vmem:[#allocation5 + $0x908] sm:$0xff]  ;;  %v1093_v45 = vld [vmem:[#allocation10 + $0x130] sm:$0xff] }
 0x14b   :  { %2537 = vmatpush1.bf16.msra.mxu0 %v2536_v12  ;;  %v1059_v12 = vld [vmem:[#allocation10 + $0x20] sm:$0xff]  ;;  %v2586_v15 = vpack.c.bf16 %v476_v6, %v474_v5  ;;  %v492_v6 = vld [vmem:[#allocation5 + $0x998] sm:$0xff] }
 0x14c   :  { %2539 = vmatprep.subr.bf16.mxu0 %v2538_v13  ;;  %v1064_v13 = vld [vmem:[#allocation10 + $0x48] sm:$0xff] }
 0x14d   :  { %v490_v5 = vld [vmem:[#allocation5 + $0x988] sm:$0xff] }
 0x14f   :  { %2541 = vmatpush1.bf16.msra.mxu0 %v2540_v20  ;;  %v457_v20 = vld [vmem:[#allocation5 + $0x880] sm:$0xff] }
 0x150   :  { %2543 = vmatprep.subr.bf16.mxu0 %v2542_v21  ;;  %v3591_v21 = vpack.c.bf16 %v1066_v16, %v1064_v13  ;;  %v2572_v23 = vpack.c.bf16 %v459_v18, %v457_v20  ;;  %v1079_v13 = vld [vmem:[#allocation10 + $0xc0] sm:$0xff]  ;;  %v475_v16 = vld [vmem:[#allocation5 + $0x910] sm:$0xff]  ;;  %v1086_v20 = vld [vmem:[#allocation10 + $0xf8] sm:$0xff] }
 0x153   :  { %2545 = vmatpush1.bf16.msra.mxu0 %v2544_v25  ;;  %v1068_v25 = vld [vmem:[#allocation10 + $0x68] sm:$0xff] }
 0x154   :  { %2547 = vmatprep.subr.bf16.mxu0 %v2546_v26  ;;  %v1070_v26 = vld [vmem:[#allocation10 + $0x78] sm:$0xff] }
 0x157   :  { %2549 = vmatpush1.bf16.msra.mxu0 %v2548_v32  ;;  %v461_v32 = vld [vmem:[#allocation5 + $0x8a0] sm:$0xff] }
 0x158   :  { %2551 = vmatprep.subr.bf16.mxu0 %v2550_v33  ;;  %v3597_v33 = vpack.c.bf16 %v1070_v26, %v1068_v25  ;;  %v2576_v43 = vpack.c.bf16 %v463_v36, %v461_v32  ;;  %v477_v25 = vld [vmem:[#allocation5 + $0x920] sm:$0xff]  ;;  %v479_v32 = vld [vmem:[#allocation5 + $0x930] sm:$0xff]  ;;  %v484_v36 = vld [vmem:[#allocation5 + $0x958] sm:$0xff] }
 0x15b   :  { %2553 = vmatpush1.bf16.msra.mxu0 %v2552_v38  ;;  %v1074_v38 = vld [vmem:[#allocation10 + $0x98] sm:$0xff] }
 0x15c   :  { %2555 = vmatprep.subr.bf16.mxu0 %v2554_v41  ;;  %v466_v41 = vld [vmem:[#allocation5 + $0x8c8] sm:$0xff]  ;;  %v3603_v48 = vpack.c.bf16 %v1074_v38, %v1072_v37  ;;  %v3624_v37 = vpack.c.bf16 %v1085_v29, %v1083_v28  ;;  %v2592_v38 = vpack.c.bf16 %v479_v32, %v477_v25  ;;  %v496_v25 = vld [vmem:[#allocation5 + $0x9b8] sm:$0xff] }
 0x15d   :  { %v2578_v50 = vpack.c.bf16 %v468_v42, %v466_v41  ;;  %v481_v41 = vld [vmem:[#allocation5 + $0x940] sm:$0xff]  ;;  %v3627_v42 = vpack.c.bf16 %v1090_v34, %v1088_v27  ;;  %v1101_v34 = vld [vmem:[#allocation10 + $0x170] sm:$0xff] }
 0x15e   :  { %877 = vmatmul.mubr.f32.vlgmr.msra.gmra.mrb[0].mxu0 %v3520_v31  ;;  %v1056_v31 = vld [vmem:[#allocation10 + $0x8] sm:$0xff]  ;;  %v1099_v27 = vld [vmem:[#allocation10 + $0x160] sm:$0xff] }
 0x15f   :  { %2557 = vmatpush1.bf16.msra.mxu0 %v2556_v46  ;;  %882 = vmatprep.mubr.f32.mxu0 %v3529_v61  ;;  %v2564_v61 = vpack.c.bf16 %v451_v59, %v449_v58  ;;  %v3580_v3 = vpack.c.bf16 %v1058_v1, %v1056_v31  ;;  %v1071_v46 = vld [vmem:[#allocation10 + $0x80] sm:$0xff]  ;;  %v2580_v59 = vpack.c.bf16 %v467_v51, %v465_v44  ;;  %v471_v1 = vld [vmem:[#allocation5 + $0x8f0] sm:$0xff]  ;;  %v1094_v51 = vld [vmem:[#allocation10 + $0x138] sm:$0xff] }
 0x160   :  { %2559 = vmatprep.subr.bf16.mxu0 %v2558_v49  ;;  %v1073_v49 = vld [vmem:[#allocation10 + $0x90] sm:$0xff] }
 0x161   :  { %2683 = vmatprep.subr.bf16.mxu1 %v3580_v3  ;;  %v3606_v58 = vpack.c.bf16 %v1073_v49, %v1071_v46  ;;  %v1089_v44 = vld [vmem:[#allocation10 + $0x110] sm:$0xff] }
 0x162   :  { %883 = vmatmul.mubr.f32.gmra.mrb[2].mxu0 %v3534_v0  ;;  %v1061_v0 = vld [vmem:[#allocation10 + $0x30] sm:$0xff]  ;;  %2685 = vmatpush1.bf16.msra.mxu1 %v3582_v10 }
 0x163   :  { %2561 = vmatpush1.bf16.msra.mxu0 %v2560_v54  ;;  %953 = vmatprep.mubr.f32.mxu0 %v3539_v4  ;;  %v3588_v4 = vpack.c.bf16 %v1061_v0, %v1059_v12  ;;  %v470_v54 = vld [vmem:[#allocation5 + $0x8e8] sm:$0xff]  ;;  %v473_v12 = vld [vmem:[#allocation5 + $0x900] sm:$0xff]  ;;  %v483_v49 = vld [vmem:[#allocation5 + $0x950] sm:$0xff] }
 0x164   :  { %2563 = vmatprep.subr.bf16.mxu0 %v2562_v57  ;;  %2687 = vmatprep.subr.bf16.mxu1 %v3584_v11  ;;  %v472_v57 = vld [vmem:[#allocation5 + $0x8f8] sm:$0xff]  ;;  %v2588_v18 = vpack.c.bf16 %v475_v16, %v473_v12 }
 0x165   :  { %v2582_v31 = vpack.c.bf16 %v472_v57, %v470_v54  ;;  %v2596_v57 = vpack.c.bf16 %v483_v49, %v481_v41  ;;  %v1097_v16 = vld [vmem:[#allocation10 + $0x150] sm:$0xff]  ;;  %v1106_v41 = vld [vmem:[#allocation10 + $0x198] sm:$0xff] }
 0x166   :  { %2689 = vmatpush1.bf16.msra.mxu1 %v3588_v4 }
 0x167   :  { %2565 = vmatpush1.bf16.msra.mxu0 %v2564_v61  ;;  %2691 = vmatprep.subr.bf16.mxu1 %v3591_v21  ;;  %v1082_v61 = vld [vmem:[#allocation10 + $0xd8] sm:$0xff] }
 0x168   :  { %2567 = vmatprep.subr.bf16.mxu0 %v2566_v9  ;;  %v2584_v9 = vpack.c.bf16 %v471_v1, %v469_v60  ;;  %v3615_v0 = vpack.c.bf16 %v1082_v61, %v1080_v2  ;;  %v487_v1 = vld [vmem:[#allocation5 + $0x970] sm:$0xff]  ;;  %v1098_v61 = vld [vmem:[#allocation10 + $0x158] sm:$0xff] }
 0x169   :  { %v1096_v2 = vld [vmem:[#allocation10 + $0x148] sm:$0xff] }
 0x16a   :  { %2693 = vmatpush1.bf16.msra.mxu1 %v3594_v30 }
 0x16b   :  { %2569 = vmatpush1.bf16.msra.mxu0 %v2568_v17  ;;  %2695 = vmatprep.subr.bf16.mxu1 %v3597_v33  ;;  %v1084_v17 = vld [vmem:[#allocation10 + $0xe8] sm:$0xff] }
 0x16c   :  { %2571 = vmatprep.subr.bf16.mxu0 %v2570_v24  ;;  %v3618_v24 = vpack.c.bf16 %v1081_v14, %v1079_v13  ;;  %v3621_v26 = vpack.c.bf16 %v1086_v20, %v1084_v17  ;;  %v489_v13 = vld [vmem:[#allocation5 + $0x980] sm:$0xff]  ;;  %v3639_v14 = vpack.c.bf16 %v1098_v61, %v1096_v2  ;;  %v2602_v17 = vpack.c.bf16 %v492_v6, %v490_v5  ;;  %v491_v20 = vld [vmem:[#allocation5 + $0x990] sm:$0xff]  ;;  %v506_v2 = vld [vmem:[#allocation5 + $0xa08] sm:$0xff] }
 0x16d   :  { %v2604_v29 = vpack.c.bf16 %v491_v20, %v489_v13  ;;  %v508_v61 = vld [vmem:[#allocation5 + $0xa18] sm:$0xff]  ;;  %v507_v13 = vld [vmem:[#allocation5 + $0xa10] sm:$0xff] }
 0x16e   :  { %2697 = vmatpush1.bf16.msra.mxu1 %v3600_v19  ;;  %v2618_v6 = vpack.c.bf16 %v508_v61, %v506_v2  ;;  %v530_v2 = vld [vmem:[#allocation5 + $0xac8] sm:$0xff]  ;;  %v532_v61 = vld [vmem:[#allocation5 + $0xad8] sm:$0xff] }
 0x16f   :  { %2573 = vmatpush1.bf16.msra.mxu0 %v2572_v23  ;;  %2699 = vmatprep.subr.bf16.mxu1 %v3603_v48  ;;  %v2590_v23 = vpack.c.bf16 %v480_v22, %v478_v56  ;;  %v1100_v56 = vld [vmem:[#allocation10 + $0x168] sm:$0xff]  ;;  %v1102_v22 = vld [vmem:[#allocation10 + $0x178] sm:$0xff] }
 0x170   :  { %2575 = vmatprep.subr.bf16.mxu0 %v2574_v35  ;;  %v482_v35 = vld [vmem:[#allocation5 + $0x948] sm:$0xff]  ;;  %v3645_v32 = vpack.c.bf16 %v1102_v22, %v1100_v56  ;;  %v509_v56 = vld [vmem:[#allocation5 + $0xa20] sm:$0xff]  ;;  %v511_v22 = vld [vmem:[#allocation5 + $0xa30] sm:$0xff] }
 0x171   :  { %v2594_v46 = vpack.c.bf16 %v484_v36, %v482_v35  ;;  %v495_v36 = vld [vmem:[#allocation5 + $0x9b0] sm:$0xff] }
 0x172   :  { %2701 = vmatpush1.bf16.msra.mxu1 %v3606_v58 }
 0x173   :  { %2577 = vmatpush1.bf16.msra.mxu0 %v2576_v43  ;;  %2703 = vmatprep.subr.bf16.mxu1 %v3609_v62  ;;  %v1087_v43 = vld [vmem:[#allocation10 + $0x100] sm:$0xff] }
 0x174   :  { %2579 = vmatprep.subr.bf16.mxu0 %v2578_v50  ;;  %v1092_v50 = vld [vmem:[#allocation10 + $0x128] sm:$0xff]  ;;  %v3630_v54 = vpack.c.bf16 %v1089_v44, %v1087_v43  ;;  %v500_v44 = vld [vmem:[#allocation5 + $0x9d8] sm:$0xff] }
 0x175   :  { %v3633_v60 = vpack.c.bf16 %v1094_v51, %v1092_v50  ;;  %v498_v43 = vld [vmem:[#allocation5 + $0x9c8] sm:$0xff] }
 0x176   :  { %2705 = vmatpush1.bf16.msra.mxu1 %v3612_v7  ;;  %v2610_v51 = vpack.c.bf16 %v500_v44, %v498_v43  ;;  %v517_v44 = vld [vmem:[#allocation5 + $0xa60] sm:$0xff] }
 0x177   :  { %2581 = vmatpush1.bf16.msra.mxu0 %v2580_v59  ;;  %2707 = vmatprep.subr.bf16.mxu1 %v3615_v0  ;;  %v485_v59 = vld [vmem:[#allocation5 + $0x960] sm:$0xff] }
 0x178   :  { %2583 = vmatprep.subr.bf16.mxu0 %v2582_v31  ;;  %v2598_v31 = vpack.c.bf16 %v488_v53, %v486_v52  ;;  %v2600_v12 = vpack.c.bf16 %v487_v1, %v485_v59  ;;  %v497_v52 = vld [vmem:[#allocation5 + $0x9c0] sm:$0xff]  ;;  %v499_v53 = vld [vmem:[#allocation5 + $0x9d0] sm:$0xff]  ;;  %v504_v59 = vld [vmem:[#allocation5 + $0x9f8] sm:$0xff] }
 0x179   :  { %v503_v1 = vld [vmem:[#allocation5 + $0x9f0] sm:$0xff] }
 0x17a   :  { %2709 = vmatpush1.bf16.msra.mxu1 %v3618_v24 }
 0x17b   :  { %2585 = vmatpush1.bf16.msra.mxu0 %v2584_v9  ;;  %2711 = vmatprep.subr.bf16.mxu1 %v3621_v26  ;;  %v3636_v9 = vpack.c.bf16 %v1093_v45, %v1091_v63  ;;  %v2612_v63 = vpack.c.bf16 %v499_v53, %v497_v52  ;;  %v521_v53 = vld [vmem:[#allocation5 + $0xa80] sm:$0xff] }
 0x17c   :  { %2587 = vmatprep.subr.bf16.mxu0 %v2586_v15  ;;  %v1095_v15 = vld [vmem:[#allocation10 + $0x140] sm:$0xff] }
 0x17d   :  { %v3642_v28 = vpack.c.bf16 %v1097_v16, %v1095_v15  ;;  %v510_v15 = vld [vmem:[#allocation5 + $0xa28] sm:$0xff]  ;;  %v512_v16 = vld [vmem:[#allocation5 + $0xa38] sm:$0xff] }
 0x17e   :  { %2713 = vmatpush1.bf16.msra.mxu1 %v3624_v37  ;;  %v2622_v20 = vpack.c.bf16 %v512_v16, %v510_v15  ;;  %v534_v15 = vld [vmem:[#allocation5 + $0xae8] sm:$0xff]  ;;  %v536_v16 = vld [vmem:[#allocation5 + $0xaf8] sm:$0xff] }
 0x17f   :  { %2589 = vmatpush1.bf16.msra.mxu0 %v2588_v18  ;;  %2715 = vmatprep.subr.bf16.mxu1 %v3627_v42  ;;  %v494_v18 = vld [vmem:[#allocation5 + $0x9a8] sm:$0xff] }
 0x180   :  { %2591 = vmatprep.subr.bf16.mxu0 %v2590_v23  ;;  %v493_v23 = vld [vmem:[#allocation5 + $0x9a0] sm:$0xff]  ;;  %v2606_v35 = vpack.c.bf16 %v496_v25, %v494_v18  ;;  %v514_v18 = vld [vmem:[#allocation5 + $0xa48] sm:$0xff]  ;;  %v516_v25 = vld [vmem:[#allocation5 + $0xa58] sm:$0xff] }
 0x181   :  { %v2608_v49 = vpack.c.bf16 %v495_v36, %v493_v23  ;;  %v2626_v23 = vpack.c.bf16 %v516_v25, %v514_v18  ;;  %v518_v36 = vld [vmem:[#allocation5 + $0xa68] sm:$0xff]  ;;  %v540_v25 = vld [vmem:[#allocation5 + $0xb18] sm:$0xff] }
 0x182   :  { %2717 = vmatpush1.bf16.msra.mxu1 %v3630_v54  ;;  %v538_v18 = vld [vmem:[#allocation5 + $0xb08] sm:$0xff] }
 0x183   :  { %2593 = vmatpush1.bf16.msra.mxu0 %v2592_v38  ;;  %2719 = vmatprep.subr.bf16.mxu1 %v3633_v60  ;;  %v1104_v38 = vld [vmem:[#allocation10 + $0x188] sm:$0xff] }
 0x184   :  { %2595 = vmatprep.subr.bf16.mxu0 %v2594_v46  ;;  %v3648_v46 = vpack.c.bf16 %v1101_v34, %v1099_v27  ;;  %v3651_v50 = vpack.c.bf16 %v1106_v41, %v1104_v38  ;;  %v513_v27 = vld [vmem:[#allocation5 + $0xa40] sm:$0xff]  ;;  %v515_v34 = vld [vmem:[#allocation5 + $0xa50] sm:$0xff]  ;;  %v520_v38 = vld [vmem:[#allocation5 + $0xa78] sm:$0xff] }
 0x185   :  { %v2628_v41 = vpack.c.bf16 %v515_v34, %v513_v27  ;;  %v2630_v43 = vpack.c.bf16 %v520_v38, %v518_v36  ;;  %v537_v27 = vld [vmem:[#allocation5 + $0xb00] sm:$0xff]  ;;  %v539_v34 = vld [vmem:[#allocation5 + $0xb10] sm:$0xff]  ;;  %v544_v36 = vld [vmem:[#allocation5 + $0xb38] sm:$0xff] }
 0x186   :  { %2721 = vmatpush1.bf16.msra.mxu1 %v3636_v9  ;;  %v2652_v38 = vpack.c.bf16 %v539_v34, %v537_v27  ;;  %v563_v27 = vld [vmem:[#allocation5 + $0xbd0] sm:$0xff]  ;;  %v566_v34 = vld [vmem:[#allocation5 + $0xbe8] sm:$0xff] }
 0x187   :  { %2597 = vmatpush1.bf16.msra.mxu0 %v2596_v57  ;;  %2723 = vmatprep.subr.bf16.mxu1 %v3639_v14  ;;  %v502_v57 = vld [vmem:[#allocation5 + $0x9e8] sm:$0xff] }
 0x188   :  { %2599 = vmatprep.subr.bf16.mxu0 %v2598_v31  ;;  %v2614_v45 = vpack.c.bf16 %v504_v59, %v502_v57  ;;  %v501_v31 = vld [vmem:[#allocation5 + $0x9e0] sm:$0xff]  ;;  %v523_v57 = vld [vmem:[#allocation5 + $0xa90] sm:$0xff]  ;;  %v526_v59 = vld [vmem:[#allocation5 + $0xaa8] sm:$0xff] }
 0x189   :  { %v2616_v5 = vpack.c.bf16 %v503_v1, %v501_v31  ;;  %v525_v31 = vld [vmem:[#allocation5 + $0xaa0] sm:$0xff]  ;;  %v527_v1 = vld [vmem:[#allocation5 + $0xab0] sm:$0xff] }
 0x18a   :  { %2725 = vmatpush1.bf16.msra.mxu1 %v3642_v28 }
 0x18b   :  { %2601 = vmatpush1.bf16.msra.mxu0 %v2600_v12  ;;  %2727 = vmatprep.subr.bf16.mxu1 %v3645_v32  ;;  %v505_v12 = vld [vmem:[#allocation5 + $0xa00] sm:$0xff] }
 0x18c   :  { %2603 = vmatprep.subr.bf16.mxu0 %v2602_v17  ;;  %v2620_v17 = vpack.c.bf16 %v507_v13, %v505_v12  ;;  %v529_v12 = vld [vmem:[#allocation5 + $0xac0] sm:$0xff]  ;;  %v531_v13 = vld [vmem:[#allocation5 + $0xad0] sm:$0xff] }
 0x18e   :  { %2729 = vmatpush1.bf16.msra.mxu1 %v3648_v46 }
 0x18f   :  { %2605 = vmatpush1.bf16.msra.mxu0 %v2604_v29  ;;  %2731 = vmatprep.subr.bf16.mxu1 %v3651_v50  ;;  %v2624_v29 = vpack.c.bf16 %v511_v22, %v509_v56  ;;  %v533_v56 = vld [vmem:[#allocation5 + $0xae0] sm:$0xff]  ;;  %v535_v22 = vld [vmem:[#allocation5 + $0xaf0] sm:$0xff] }
 0x190   :  { %2607 = vmatprep.subr.bf16.mxu0 %v2606_v35  ;;  %v172_v35 = vld [vmem:[#allocation2 + $0x58] sm:$0xff] }
 0x193   :  { %2609 = vmatpush1.bf16.msra.mxu0 %v2608_v49  ;;  %v522_v49 = vld [vmem:[#allocation5 + $0xa88] sm:$0xff] }
 0x194   :  { %2611 = vmatprep.subr.bf16.mxu0 %v2610_v51  ;;  %v524_v51 = vld [vmem:[#allocation5 + $0xa98] sm:$0xff] }
 0x195   :  { %v2634_v52 = vpack.c.bf16 %v524_v51, %v522_v49  ;;  %v548_v49 = vld [vmem:[#allocation5 + $0xb58] sm:$0xff] }
 0x197   :  { %2613 = vmatpush1.bf16.msra.mxu0 %v2612_v63  ;;  %v528_v63 = vld [vmem:[#allocation5 + $0xab8] sm:$0xff] }
 0x198   :  { %2615 = vmatprep.subr.bf16.mxu0 %v2614_v45  ;;  %v2636_v45 = vpack.c.bf16 %v523_v57, %v521_v53  ;;  %v547_v53 = vld [vmem:[#allocation5 + $0xb50] sm:$0xff]  ;;  %v550_v57 = vld [vmem:[#allocation5 + $0xb68] sm:$0xff] }
 0x19b   :  { %2617 = vmatpush1.bf16.msra.mxu0 %v2616_v5  ;;  %v2640_v5 = vpack.c.bf16 %v527_v1, %v525_v31  ;;  %v551_v31 = vld [vmem:[#allocation5 + $0xb70] sm:$0xff]  ;;  %v554_v1 = vld [vmem:[#allocation5 + $0xb88] sm:$0xff] }
 0x19c   :  { %2619 = vmatprep.subr.bf16.mxu0 %v2618_v6  ;;  %v2642_v6 = vpack.c.bf16 %v532_v61, %v530_v2  ;;  %v556_v2 = vld [vmem:[#allocation5 + $0xb98] sm:$0xff] }
 0x19e   :  { %954 = vmatmul.mubr.f32.vlgmr.msra.gmra.mrb[0].mxu0 %v3544_v8  ;;  %v519_v8 = vld [vmem:[#allocation5 + $0xa70] sm:$0xff] }
 0x19f   :  { %2621 = vmatpush1.bf16.msra.mxu0 %v2620_v17  ;;  %959 = vmatprep.mubr.f32.mxu0 %v3556_v39  ;;  %v2632_v39 = vpack.c.bf16 %v519_v8, %v517_v44  ;;  %v2644_v17 = vpack.c.bf16 %v531_v13, %v529_v12  ;;  %v543_v44 = vld [vmem:[#allocation5 + $0xb30] sm:$0xff]  ;;  %v546_v8 = vld [vmem:[#allocation5 + $0xb48] sm:$0xff] }
 0x1a0   :  { %2623 = vmatprep.subr.bf16.mxu0 %v2622_v20  ;;  %v2646_v20 = vpack.c.bf16 %v536_v16, %v534_v15  ;;  %v555_v12 = vld [vmem:[#allocation5 + $0xb90] sm:$0xff]  ;;  %v558_v13 = vld [vmem:[#allocation5 + $0xba8] sm:$0xff]  ;;  %v560_v15 = vld [vmem:[#allocation5 + $0xbb8] sm:$0xff] }
 0x1a2   :  { %960 = vmatmul.mubr.f32.gmra.mrb[2].mxu0 %v3561_v40  ;;  %v2638_v40 = vpack.c.bf16 %v528_v63, %v526_v59  ;;  %v552_v59 = vld [vmem:[#allocation5 + $0xb78] sm:$0xff] }
 0x1a3   :  { %2625 = vmatpush1.bf16.msra.mxu0 %v2624_v29  ;;  %1030 = vmatprep.mubr.f32.mxu0 %v172_v35  ;;  %v2648_v29 = vpack.c.bf16 %v535_v22, %v533_v56  ;;  %v542_v35 = vld [vmem:[#allocation5 + $0xb28] sm:$0xff]  ;;  %v559_v56 = vld [vmem:[#allocation5 + $0xbb0] sm:$0xff] }
 0x1a4   :  { %2627 = vmatprep.subr.bf16.mxu0 %v2626_v23  ;;  %v2650_v23 = vpack.c.bf16 %v540_v25, %v538_v18  ;;  %v562_v22 = vld [vmem:[#allocation5 + $0xbc8] sm:$0xff]  ;;  %v564_v18 = vld [vmem:[#allocation5 + $0xbd8] sm:$0xff] }
 0x1a7   :  { %2629 = vmatpush1.bf16.msra.mxu0 %v2628_v41  ;;  %v2654_v41 = vpack.c.bf16 %v544_v36, %v542_v35  ;;  %v568_v35 = vld [vmem:[#allocation5 + $0xbf8] sm:$0xff] }
 0x1a8   :  { %2631 = vmatprep.subr.bf16.mxu0 %v2630_v43  ;;  %v541_v43 = vld [vmem:[#allocation5 + $0xb20] sm:$0xff] }
 0x1a9   :  { %v2656_v51 = vpack.c.bf16 %v543_v44, %v541_v43  ;;  %v567_v43 = vld [vmem:[#allocation5 + $0xbf0] sm:$0xff] }
 0x1ab   :  { %2633 = vmatpush1.bf16.msra.mxu0 %v2632_v39  ;;  %v2658_v39 = vpack.c.bf16 %v548_v49, %v546_v8  ;;  %v184_v8 = vld [vmem:[#allocation2 + $0xb8] sm:$0xff]  ;;  %v1103_v49 = vld [vmem:[#allocation10 + $0x180] sm:$0xff] }
 0x1ac   :  { %2635 = vmatprep.subr.bf16.mxu0 %v2634_v52  ;;  %v545_v52 = vld [vmem:[#allocation5 + $0xb40] sm:$0xff] }
 0x1ad   :  { %v2660_v63 = vpack.c.bf16 %v547_v53, %v545_v52  ;;  %v1108_v52 = vld [vmem:[#allocation10 + $0x1a8] sm:$0xff]  ;;  %v1110_v53 = vld [vmem:[#allocation10 + $0x1b8] sm:$0xff] }
 0x1af   :  { %2637 = vmatpush1.bf16.msra.mxu0 %v2636_v45  ;;  %v2662_v45 = vpack.c.bf16 %v552_v59, %v550_v57  ;;  %v3663_v57 = vpack.c.bf16 %v1110_v53, %v1108_v52  ;;  %v1107_v59 = vld [vmem:[#allocation10 + $0x1a0] sm:$0xff] }
 0x1b0   :  { %2639 = vmatprep.subr.bf16.mxu0 %v2638_v40  ;;  %v549_v40 = vld [vmem:[#allocation5 + $0xb60] sm:$0xff] }
 0x1b1   :  { %v2664_v61 = vpack.c.bf16 %v551_v31, %v549_v40  ;;  %v1111_v31 = vld [vmem:[#allocation10 + $0x1c0] sm:$0xff] }
 0x1b3   :  { %2641 = vmatpush1.bf16.msra.mxu0 %v2640_v5  ;;  %v2666_v5 = vpack.c.bf16 %v556_v2, %v554_v1  ;;  %v1113_v1 = vld [vmem:[#allocation10 + $0x1d0] sm:$0xff] }
 0x1b4   :  { %2643 = vmatprep.subr.bf16.mxu0 %v2642_v6  ;;  %v553_v6 = vld [vmem:[#allocation5 + $0xb80] sm:$0xff]  ;;  %v3671_v2 = vpack.c.bf16 %v1113_v1, %v1111_v31 }
 0x1b5   :  { %v2668_v16 = vpack.c.bf16 %v555_v12, %v553_v6  ;;  %v1115_v6 = vld [vmem:[#allocation10 + $0x1e0] sm:$0xff] }
 0x1b7   :  { %2645 = vmatpush1.bf16.msra.mxu0 %v2644_v17  ;;  %v2670_v17 = vpack.c.bf16 %v560_v15, %v558_v13  ;;  %v1117_v13 = vld [vmem:[#allocation10 + $0x1f0] sm:$0xff] }
 0x1b8   :  { %2647 = vmatprep.subr.bf16.mxu0 %v2646_v20  ;;  %v557_v20 = vld [vmem:[#allocation5 + $0xba0] sm:$0xff]  ;;  %v3677_v15 = vpack.c.bf16 %v1117_v13, %v1115_v6 }
 0x1b9   :  { %v2672_v25 = vpack.c.bf16 %v559_v56, %v557_v20  ;;  %v569_v56 = vld [vmem:[#allocation8] sm:$0x3] }
 0x1bb   :  { %2649 = vmatpush1.bf16.msra.mxu0 %v2648_v29  ;;  %v2674_v29 = vpack.c.bf16 %v564_v18, %v562_v22 }
 0x1bc   :  { %2651 = vmatprep.subr.bf16.mxu0 %v2650_v23  ;;  %v561_v23 = vld [vmem:[#allocation5 + $0xbc0] sm:$0xff] }
 0x1bd   :  { %v2676_v36 = vpack.c.bf16 %v563_v27, %v561_v23 }
 0x1bf   :  { %2653 = vmatpush1.bf16.msra.mxu0 %v2652_v38  ;;  %v2678_v38 = vpack.c.bf16 %v568_v35, %v566_v34 }
 0x1c0   :  { %2655 = vmatprep.subr.bf16.mxu0 %v2654_v41  ;;  %v565_v41 = vld [vmem:[#allocation5 + $0xbe0] sm:$0xff] }
 0x1c1   :  { %v2680_v44 = vpack.c.bf16 %v567_v43, %v565_v41 }
 0x1c3   :  { %2657 = vmatpush1.bf16.msra.mxu0 %v2656_v51  ;;  %v1105_v51 = vld [vmem:[#allocation10 + $0x190] sm:$0xff] }
 0x1c4   :  { %2659 = vmatprep.subr.bf16.mxu0 %v2658_v39  ;;  %v3660_v39 = vpack.c.bf16 %v1105_v51, %v1103_v49 }
 0x1c6   :  { %2733 = vmatpush1.bf16.msra.mxu1 %v3660_v39 }
 0x1c7   :  { %2661 = vmatpush1.bf16.msra.mxu0 %v2660_v63  ;;  %v1109_v63 = vld [vmem:[#allocation10 + $0x1b0] sm:$0xff]  ;;  %2735 = vmatprep.subr.bf16.mxu1 %v3663_v57 }
 0x1c8   :  { %2663 = vmatprep.subr.bf16.mxu0 %v2662_v45  ;;  %v3665_v45 = vpack.c.bf16 %v1109_v63, %v1107_v59 }
 0x1ca   :  { %2737 = vmatpush1.bf16.msra.mxu1 %v3665_v45 }
 0x1cb   :  { %2665 = vmatpush1.bf16.msra.mxu0 %v2664_v61  ;;  %v1116_v61 = vld [vmem:[#allocation10 + $0x1e8] sm:$0xff] }
 0x1cc   :  { %2667 = vmatprep.subr.bf16.mxu0 %v2666_v5  ;;  %v1118_v5 = vld [vmem:[#allocation10 + $0x1f8] sm:$0xff] }
 0x1cd   :  { %v3675_v12 = vpack.c.bf16 %v1118_v5, %v1116_v61 }
 0x1cf   :  { %2669 = vmatpush1.bf16.msra.mxu0 %v2668_v16  ;;  %v571_v16 = vlaneseq }
 0x1d0   :  { %2671 = vmatprep.subr.bf16.mxu0 %v2670_v17 }
 0x1d1   :  { %v572_v17 = vshrl.u32 %v571_v16, 7 }
 0x1d3   :  { %2673 = vmatpush1.bf16.msra.mxu0 %v2672_v25  ;;  %v573_v20 = vsub.s32 0, %v572_v17  ;;  %v577_v22 = vsub.s32 1, %v572_v17 }
 0x1d4   :  { %2675 = vmatprep.subr.bf16.mxu0 %v2674_v29 }
 0x1d5   :  { %v574_v18 = vrot.slane %v569_v56, %v573_v20  ;;  %v578_v25 = vrot.slane %v569_v56, %v577_v22 }
 0x1d7   :  { %2677 = vmatpush1.bf16.msra.mxu0 %v2676_v36 }
 0x1d8   :  { %2679 = vmatprep.subr.bf16.mxu0 %v2678_v38 }
 0x1db   :  { %2681 = vmatpush1.bf16.msra.mxu0 %v2680_v44 }
 0x1de   :  { %1031 = vmatmul.mubr.f32.vlgmr.msra.gmra.mrb[0].mxu0 %v3569_v47  ;;  %v1112_v47 = vld [vmem:[#allocation10 + $0x1c8] sm:$0xff] }
 0x1df   :  { %1036 = vmatprep.mubr.f32.mxu0 %v184_v8 }
 0x1e2   :  { %1037 = vmatmul.mubr.f32.gmra.mrb[2].mxu0 %v3576_v55  ;;  %v1114_v55 = vld [vmem:[#allocation10 + $0x1d8] sm:$0xff] }
 0x1e3   :  { %v3669_v40 = vpack.c.bf16 %v1114_v55, %v1112_v47 }
 0x1e5   :  { %2739 = vmatprep.subr.bf16.mxu1 %v3669_v40 }
 0x1e6   :  { %2741 = vmatpush1.bf16.msra.mxu1 %v3671_v2 }
 0x1e7   :  { %2743 = vmatprep.subr.bf16.mxu1 %v3675_v12 }
 0x1ea   :  { %2745 = vmatpush1.bf16.msra.mxu1 %v3677_v15 }
 0x1eb   :  { %2747 = vmatprep.subr.bf16.mxu1 %v3580_v3 }
 0x2b1   :  { %v1032_v29 = vpop.f32.mrb[0].mxu0 }
 0x2b2   :  { %v3162_v23 = vadd.f32 %v1032_v29, %v574_v18  ;;  %v1034_v27 = vpop.f32.mrb[1].mxu0 }
 0x2b3   :  { %v3163_v34 = vadd.f32 %v1034_v27, %v578_v25 }
 0x2b4   :  { %1043 = vst [vmem:[#allocation3] sm:$0xff] %v3162_v23 }
 0x2b5   :  { %1044 = vst [vmem:[#allocation3 + $0x8] sm:$0xff] %v3163_v34  ;;  %v1038_v35 = vpop.f32.mrb[2].mxu0 }
 0x2b6   :  { %v3164_v36 = vadd.f32 %v1038_v35, %v574_v18  ;;  %v1040_v38 = vpop.f32.mrb[3].mxu0 }
 0x2b7   :  { %v3165_v41 = vadd.f32 %v1040_v38, %v578_v25  ;;  %v1685_v38 = vld [vmem:[#allocation10 + $0xb0] sm:$0xff] }
 0x2b8   :  { %1045 = vst [vmem:[#allocation3 + $0x10] sm:$0xff] %v3164_v36  ;;  %v1683_v36 = vld [vmem:[#allocation10 + $0xa0] sm:$0xff] }
 0x2b9   :  { %1046 = vst [vmem:[#allocation3 + $0x18] sm:$0xff] %v3165_v41  ;;  %v1688_v41 = vld [vmem:[#allocation10 + $0xc8] sm:$0xff] }
 0x2bb   :  { %v1047_v43 = vld [vmem:[#allocation3] sm:$0x3]  ;;  %v1053_v59 = vld [vmem:[#allocation3] sm:$0xc]  ;;  %v1202_v20 = vld [vmem:[#allocation3] sm:$0x30] }
 0x2bc   :  { %v1048_v44 = vld [vmem:[#allocation3 + $0x8] sm:$0x3]  ;;  %v1049_v8 = vmax.f32 %v1047_v43, 0.0  ;;  %v1054_v55 = vld [vmem:[#allocation3 + $0x8] sm:$0xc]  ;;  %v1690_v43 = vld [vmem:[#allocation10 + $0xd8] sm:$0xff] }
 0x2bd   :  { %v1050_v49 = vmax.f32 %v1048_v44, 0.0  ;;  %v1203_v18 = vld [vmem:[#allocation3 + $0x8] sm:$0x30]  ;;  %v3811_v44 = vpack.c.bf16 %v1685_v38, %v1683_v36 }
 0x2be   :  { %1051 = vst [vmem:[#allocation4] sm:$0x3] %v1049_v8 }
 0x2bf   :  { %1052 = vst [vmem:[#allocation4 + $0x8] sm:$0x3] %v1050_v49  ;;  %1183 = vmatprep.mubr.f32.mxu1 %v1050_v49  ;;  %v1687_v49 = vld [vmem:[#allocation10 + $0xc0] sm:$0xff] }
 0x2c0   :  { %1184 = vmatmul.mubr.f32.vlgmr.msra.gmra.mrb[0].mxu1 %v1049_v8  ;;  %v3813_v8 = vpack.c.bf16 %v1690_v43, %v1688_v41 }
 0x2c1   :  { %2749 = vmatpush1.bf16.msra.mxu1 %v3582_v10 }
 0x2c2   :  { %2751 = vmatprep.subr.bf16.mxu1 %v3584_v11 }
 0x2c5   :  { %2753 = vmatpush1.bf16.msra.mxu1 %v3588_v4 }
 0x2c6   :  { %2755 = vmatprep.subr.bf16.mxu1 %v3591_v21 }
 0x2c9   :  { %2757 = vmatpush1.bf16.msra.mxu1 %v3594_v30 }
 0x2ca   :  { %2759 = vmatprep.subr.bf16.mxu1 %v3597_v33 }
 0x2cd   :  { %2761 = vmatpush1.bf16.msra.mxu1 %v3600_v19 }
 0x2ce   :  { %2763 = vmatprep.subr.bf16.mxu1 %v3603_v48 }
 0x2d1   :  { %2765 = vmatpush1.bf16.msra.mxu1 %v3606_v58 }
 0x2d2   :  { %2767 = vmatprep.subr.bf16.mxu1 %v3609_v62 }
 0x2d5   :  { %2769 = vmatpush1.bf16.msra.mxu1 %v3612_v7 }
 0x2d6   :  { %2771 = vmatprep.subr.bf16.mxu1 %v3615_v0 }
 0x2d9   :  { %2773 = vmatpush1.bf16.msra.mxu1 %v3618_v24 }
 0x2da   :  { %2775 = vmatprep.subr.bf16.mxu1 %v3621_v26 }
 0x2dd   :  { %2777 = vmatpush1.bf16.msra.mxu1 %v3624_v37 }
 0x2de   :  { %2779 = vmatprep.subr.bf16.mxu1 %v3627_v42 }
 0x2e1   :  { %2781 = vmatpush1.bf16.msra.mxu1 %v3630_v54 }
 0x2e2   :  { %2783 = vmatprep.subr.bf16.mxu1 %v3633_v60 }
 0x2e5   :  { %2785 = vmatpush1.bf16.msra.mxu1 %v3636_v9 }
 0x2e6   :  { %2787 = vmatprep.subr.bf16.mxu1 %v3639_v14 }
 0x2e9   :  { %2789 = vmatpush1.bf16.msra.mxu1 %v3642_v28 }
 0x2ea   :  { %2791 = vmatprep.subr.bf16.mxu1 %v3645_v32 }
 0x2ed   :  { %2793 = vmatpush1.bf16.msra.mxu1 %v3648_v46 }
 0x2ee   :  { %2795 = vmatprep.subr.bf16.mxu1 %v3651_v50 }
 0x2f1   :  { %2797 = vmatpush1.bf16.msra.mxu1 %v3660_v39 }
 0x2f2   :  { %2799 = vmatprep.subr.bf16.mxu1 %v3663_v57 }
 0x2f5   :  { %2801 = vmatpush1.bf16.msra.mxu1 %v3665_v45 }
 0x2f6   :  { %2803 = vmatprep.subr.bf16.mxu1 %v3669_v40 }
 0x2f9   :  { %2805 = vmatpush1.bf16.msra.mxu1 %v3671_v2 }
 0x2fa   :  { %2807 = vmatprep.subr.bf16.mxu1 %v3675_v12 }
 0x2fd   :  { %2809 = vmatpush1.bf16.msra.mxu1 %v3677_v15 }
 0x2fe   :  { %2811 = vmatprep.subr.bf16.mxu1 %v3580_v3 }
 0x393   :  { %v1185_v51 = vpop.f32.mrb[0].mxu1 }
 0x394   :  { %v1192_v52 = vrot.slane %v1185_v51, 6  ;;  %v1187_v53 = vpop.f32.mrb[1].mxu1  ;;  %v1689_v51 = vld [vmem:[#allocation10 + $0xd0] sm:$0xff] }
 0x395   :  { %v1193_v63 = vrot.slane %v1187_v53, 6  ;;  %v1694_v53 = vld [vmem:[#allocation10 + $0xf8] sm:$0xff] }
 0x396   :  { %v1196_v47 = vadd.f32 %v1192_v52, %v1053_v59  ;;  %v1692_v52 = vld [vmem:[#allocation10 + $0xe8] sm:$0xff]  ;;  %v3817_v59 = vpack.c.bf16 %v1689_v51, %v1687_v49  ;;  %v1357_v49 = vld [vmem:[#allocation3] sm:$0xc0] }
 0x397   :  { %v1197_v31 = vadd.f32 %v1193_v63, %v1054_v55  ;;  %v3819_v63 = vpack.c.bf16 %v1694_v53, %v1692_v52  ;;  %v1693_v55 = vld [vmem:[#allocation10 + $0xf0] sm:$0xff]  ;;  %v1358_v53 = vld [vmem:[#allocation3 + $0x8] sm:$0xc0] }
 0x398   :  { %v1198_v1 = vmax.f32 %v1196_v47, 0.0  ;;  %v1691_v47 = vld [vmem:[#allocation10 + $0xe0] sm:$0xff] }
 0x399   :  { %v1199_v61 = vmax.f32 %v1197_v31, 0.0  ;;  %v1696_v31 = vld [vmem:[#allocation10 + $0x108] sm:$0xff] }
 0x39a   :  { %1200 = vst [vmem:[#allocation4] sm:$0xc] %v1198_v1  ;;  %v1270_v6 = vrot.slane %v1198_v1, 2  ;;  %v1698_v1 = vld [vmem:[#allocation10 + $0x118] sm:$0xff] }
 0x39b   :  { %1201 = vst [vmem:[#allocation4 + $0x8] sm:$0xc] %v1199_v61  ;;  %v1271_v5 = vrot.slane %v1199_v61, 2  ;;  %v3823_v61 = vpack.c.bf16 %v1693_v55, %v1691_v47 }
 0x39d   :  { %1338 = vmatprep.mubr.f32.mxu1 %v1271_v5  ;;  %v3825_v5 = vpack.c.bf16 %v1698_v1, %v1696_v31 }
 0x39e   :  { %1339 = vmatmul.mubr.f32.vlgmr.msra.gmra.mrb[2].mxu1 %v1270_v6  ;;  %v1695_v6 = vld [vmem:[#allocation10 + $0x100] sm:$0xff] }
 0x39f   :  { %2813 = vmatpush1.bf16.msra.mxu1 %v3582_v10 }
 0x3a0   :  { %2815 = vmatprep.subr.bf16.mxu1 %v3584_v11 }
 0x3a3   :  { %2817 = vmatpush1.bf16.msra.mxu1 %v3588_v4 }
 0x3a4   :  { %2819 = vmatprep.subr.bf16.mxu1 %v3591_v21 }
 0x3a7   :  { %2821 = vmatpush1.bf16.msra.mxu1 %v3594_v30 }
 0x3a8   :  { %2823 = vmatprep.subr.bf16.mxu1 %v3597_v33 }
 0x3ab   :  { %2825 = vmatpush1.bf16.msra.mxu1 %v3600_v19 }
 0x3ac   :  { %2827 = vmatprep.subr.bf16.mxu1 %v3603_v48 }
 0x3af   :  { %2829 = vmatpush1.bf16.msra.mxu1 %v3606_v58 }
 0x3b0   :  { %2831 = vmatprep.subr.bf16.mxu1 %v3609_v62 }
 0x3b3   :  { %2833 = vmatpush1.bf16.msra.mxu1 %v3612_v7 }
 0x3b4   :  { %2835 = vmatprep.subr.bf16.mxu1 %v3615_v0 }
 0x3b7   :  { %2837 = vmatpush1.bf16.msra.mxu1 %v3618_v24 }
 0x3b8   :  { %2839 = vmatprep.subr.bf16.mxu1 %v3621_v26 }
 0x3bb   :  { %2841 = vmatpush1.bf16.msra.mxu1 %v3624_v37 }
 0x3bc   :  { %2843 = vmatprep.subr.bf16.mxu1 %v3627_v42 }
 0x3bf   :  { %2845 = vmatpush1.bf16.msra.mxu1 %v3630_v54 }
 0x3c0   :  { %2847 = vmatprep.subr.bf16.mxu1 %v3633_v60 }
 0x3c3   :  { %2849 = vmatpush1.bf16.msra.mxu1 %v3636_v9 }
 0x3c4   :  { %2851 = vmatprep.subr.bf16.mxu1 %v3639_v14 }
 0x3c7   :  { %2853 = vmatpush1.bf16.msra.mxu1 %v3642_v28 }
 0x3c8   :  { %2855 = vmatprep.subr.bf16.mxu1 %v3645_v32 }
 0x3cb   :  { %2857 = vmatpush1.bf16.msra.mxu1 %v3648_v46 }
 0x3cc   :  { %2859 = vmatprep.subr.bf16.mxu1 %v3651_v50 }
 0x3cf   :  { %2861 = vmatpush1.bf16.msra.mxu1 %v3660_v39 }
 0x3d0   :  { %2863 = vmatprep.subr.bf16.mxu1 %v3663_v57 }
 0x3d3   :  { %2865 = vmatpush1.bf16.msra.mxu1 %v3665_v45 }
 0x3d4   :  { %2867 = vmatprep.subr.bf16.mxu1 %v3669_v40 }
 0x3d7   :  { %2869 = vmatpush1.bf16.msra.mxu1 %v3671_v2 }
 0x3d8   :  { %2871 = vmatprep.subr.bf16.mxu1 %v3675_v12 }
 0x3db   :  { %2873 = vmatpush1.bf16.msra.mxu1 %v3677_v15 }
 0x3dc   :  { %2875 = vmatprep.subr.bf16.mxu1 %v3580_v3  ;;  %v1664_v3 = vld [vmem:[#allocation10 + $0x8] sm:$0xff] }
 0x471   :  { %v1340_v13 = vpop.f32.mrb[2].mxu1 }
 0x472   :  { %v1347_v16 = vrot.slane %v1340_v13, 4  ;;  %v1342_v17 = vpop.f32.mrb[3].mxu1  ;;  %v1697_v13 = vld [vmem:[#allocation10 + $0x110] sm:$0xff] }
 0x473   :  { %v1348_v56 = vrot.slane %v1342_v17, 4  ;;  %v1702_v17 = vld [vmem:[#allocation10 + $0x138] sm:$0xff] }
 0x474   :  { %v1351_v22 = vadd.f32 %v1347_v16, %v1202_v20  ;;  %v1700_v16 = vld [vmem:[#allocation10 + $0x128] sm:$0xff]  ;;  %v3829_v20 = vpack.c.bf16 %v1697_v13, %v1695_v6  ;;  %v1719_v13 = vld [vmem:[#allocation10 + $0x1c0] sm:$0xff] }
 0x475   :  { %v1352_v25 = vadd.f32 %v1348_v56, %v1203_v18  ;;  %v3831_v56 = vpack.c.bf16 %v1702_v17, %v1700_v16  ;;  %v1701_v18 = vld [vmem:[#allocation10 + $0x130] sm:$0xff] }
 0x476   :  { %v1353_v29 = vmax.f32 %v1351_v22, 0.0  ;;  %v1699_v22 = vld [vmem:[#allocation10 + $0x120] sm:$0xff]  ;;  %v1721_v16 = vld [vmem:[#allocation10 + $0x1d0] sm:$0xff] }
 0x477   :  { %v1354_v23 = vmax.f32 %v1352_v25, 0.0  ;;  %v1704_v25 = vld [vmem:[#allocation10 + $0x148] sm:$0xff]  ;;  %v2996_v17 = vpack.c.bf16 %v1721_v16, %v1719_v13  ;;  %v2135_v13 = vld [vmem:[#allocation11 + $0x58] sm:$0xff]  ;;  %v2152_v16 = vld [vmem:[#allocation11 + $0xe0] sm:$0xff] }
 0x478   :  { %1355 = vst [vmem:[#allocation4] sm:$0x30] %v1353_v29  ;;  %v1425_v34 = vrot.slane %v1353_v29, 4  ;;  %v1706_v29 = vld [vmem:[#allocation10 + $0x158] sm:$0xff] }
 0x479   :  { %1356 = vst [vmem:[#allocation4 + $0x8] sm:$0x30] %v1354_v23  ;;  %v1426_v27 = vrot.slane %v1354_v23, 4  ;;  %v3835_v23 = vpack.c.bf16 %v1701_v18, %v1699_v22  ;;  %v1724_v22 = vld [vmem:[#allocation10 + $0x1e8] sm:$0xff]  ;;  %v1726_v18 = vld [vmem:[#allocation10 + $0x1f8] sm:$0xff] }
 0x47b   :  { %1493 = vmatprep.mubr.f32.mxu1 %v1426_v27  ;;  %v3837_v27 = vpack.c.bf16 %v1706_v29, %v1704_v25  ;;  %v2998_v25 = vpack.c.bf16 %v1726_v18, %v1724_v22  ;;  %v1723_v29 = vld [vmem:[#allocation10 + $0x1e0] sm:$0xff] }
 0x47c   :  { %1494 = vmatmul.mubr.f32.vlgmr.msra.gmra.mrb[4].mxu1 %v1425_v34  ;;  %v1703_v34 = vld [vmem:[#allocation10 + $0x140] sm:$0xff] }
 0x47d   :  { %2877 = vmatpush1.bf16.msra.mxu1 %v3582_v10  ;;  %v1666_v10 = vld [vmem:[#allocation10 + $0x18] sm:$0xff] }
 0x47e   :  { %2879 = vmatprep.subr.bf16.mxu1 %v3584_v11  ;;  %v1663_v11 = vld [vmem:[#allocation10] sm:$0xff] }
 0x481   :  { %2881 = vmatpush1.bf16.msra.mxu1 %v3588_v4  ;;  %v3777_v4 = vpack.c.bf16 %v1666_v10, %v1664_v3  ;;  %v1705_v3 = vld [vmem:[#allocation10 + $0x150] sm:$0xff]  ;;  %v1708_v10 = vld [vmem:[#allocation10 + $0x168] sm:$0xff] }
 0x482   :  { %2883 = vmatprep.subr.bf16.mxu1 %v3591_v21  ;;  %v1665_v21 = vld [vmem:[#allocation10 + $0x10] sm:$0xff] }
 0x483   :  { %3067 = vmatprep.subr.bf16.mxu0 %v3777_v4 }
 0x485   :  { %2885 = vmatpush1.bf16.msra.mxu1 %v3594_v30  ;;  %v1668_v30 = vld [vmem:[#allocation10 + $0x28] sm:$0xff] }
 0x486   :  { %2887 = vmatprep.subr.bf16.mxu1 %v3597_v33  ;;  %v1670_v33 = vld [vmem:[#allocation10 + $0x38] sm:$0xff] }
 0x489   :  { %2889 = vmatpush1.bf16.msra.mxu1 %v3600_v19  ;;  %v3779_v19 = vpack.c.bf16 %v1665_v21, %v1663_v11  ;;  %v1710_v11 = vld [vmem:[#allocation10 + $0x178] sm:$0xff]  ;;  %v3841_v21 = vpack.c.bf16 %v1705_v3, %v1703_v34  ;;  %v1725_v34 = vld [vmem:[#allocation10 + $0x1f0] sm:$0xff] }
 0x48a   :  { %2891 = vmatprep.subr.bf16.mxu1 %v3603_v48  ;;  %v3782_v48 = vpack.c.bf16 %v1670_v33, %v1668_v30  ;;  %v3843_v30 = vpack.c.bf16 %v1710_v11, %v1708_v10  ;;  %v1707_v33 = vld [vmem:[#allocation10 + $0x160] sm:$0xff]  ;;  %v3000_v3 = vpack.c.bf16 %v1725_v34, %v1723_v29  ;;  %v1512_v10 = vld [vmem:[#allocation3 + $0x10] sm:$0x3]  ;;  %v2154_v34 = vld [vmem:[#allocation11 + $0xf0] sm:$0xff] }
 0x48b   :  { %3069 = vmatpush1.bf16.msra.mxu0 %v3779_v19  ;;  %v2137_v29 = vld [vmem:[#allocation11 + $0x68] sm:$0xff] }
 0x48c   :  { %3071 = vmatprep.subr.bf16.mxu0 %v3782_v48 }
 0x48d   :  { %2893 = vmatpush1.bf16.msra.mxu1 %v3606_v58  ;;  %v1667_v58 = vld [vmem:[#allocation10 + $0x20] sm:$0xff] }
 0x48e   :  { %2895 = vmatprep.subr.bf16.mxu1 %v3609_v62  ;;  %v1669_v62 = vld [vmem:[#allocation10 + $0x30] sm:$0xff] }
 0x491   :  { %2897 = vmatpush1.bf16.msra.mxu1 %v3612_v7  ;;  %v1672_v7 = vld [vmem:[#allocation10 + $0x48] sm:$0xff] }
 0x492   :  { %2899 = vmatprep.subr.bf16.mxu1 %v3615_v0  ;;  %v1674_v0 = vld [vmem:[#allocation10 + $0x58] sm:$0xff] }
 0x495   :  { %2901 = vmatpush1.bf16.msra.mxu1 %v3618_v24  ;;  %v3787_v24 = vpack.c.bf16 %v1669_v62, %v1667_v58  ;;  %v1709_v58 = vld [vmem:[#allocation10 + $0x170] sm:$0xff]  ;;  %v1712_v62 = vld [vmem:[#allocation10 + $0x188] sm:$0xff] }
 0x496   :  { %2903 = vmatprep.subr.bf16.mxu1 %v3621_v26  ;;  %v3789_v26 = vpack.c.bf16 %v1674_v0, %v1672_v7  ;;  %v1714_v7 = vld [vmem:[#allocation10 + $0x198] sm:$0xff]  ;;  %v3847_v0 = vpack.c.bf16 %v1709_v58, %v1707_v33  ;;  %v1513_v58 = vld [vmem:[#allocation3 + $0x18] sm:$0x3] }
 0x497   :  { %3073 = vmatpush1.bf16.msra.mxu0 %v3787_v24 }
 0x498   :  { %3075 = vmatprep.subr.bf16.mxu0 %v3789_v26 }
 0x499   :  { %2905 = vmatpush1.bf16.msra.mxu1 %v3624_v37  ;;  %v1671_v37 = vld [vmem:[#allocation10 + $0x40] sm:$0xff] }
 0x49a   :  { %2907 = vmatprep.subr.bf16.mxu1 %v3627_v42  ;;  %v1673_v42 = vld [vmem:[#allocation10 + $0x50] sm:$0xff] }
 0x49d   :  { %2909 = vmatpush1.bf16.msra.mxu1 %v3630_v54  ;;  %v1676_v54 = vld [vmem:[#allocation10 + $0x68] sm:$0xff] }
 0x49e   :  { %2911 = vmatprep.subr.bf16.mxu1 %v3633_v60  ;;  %v1678_v60 = vld [vmem:[#allocation10 + $0x78] sm:$0xff] }
 0x4a1   :  { %2913 = vmatpush1.bf16.msra.mxu1 %v3636_v9  ;;  %v3793_v9 = vpack.c.bf16 %v1673_v42, %v1671_v37  ;;  %v3849_v37 = vpack.c.bf16 %v1714_v7, %v1712_v62  ;;  %v1711_v42 = vld [vmem:[#allocation10 + $0x180] sm:$0xff] }
 0x4a2   :  { %2915 = vmatprep.subr.bf16.mxu1 %v3639_v14  ;;  %v3795_v14 = vpack.c.bf16 %v1678_v60, %v1676_v54  ;;  %v1713_v54 = vld [vmem:[#allocation10 + $0x190] sm:$0xff]  ;;  %v1716_v60 = vld [vmem:[#allocation10 + $0x1a8] sm:$0xff] }
 0x4a3   :  { %3077 = vmatpush1.bf16.msra.mxu0 %v3793_v9 }
 0x4a4   :  { %3079 = vmatprep.subr.bf16.mxu0 %v3795_v14 }
 0x4a5   :  { %2917 = vmatpush1.bf16.msra.mxu1 %v3642_v28  ;;  %v1675_v28 = vld [vmem:[#allocation10 + $0x60] sm:$0xff] }
 0x4a6   :  { %2919 = vmatprep.subr.bf16.mxu1 %v3645_v32  ;;  %v1677_v32 = vld [vmem:[#allocation10 + $0x70] sm:$0xff] }
 0x4a9   :  { %2921 = vmatpush1.bf16.msra.mxu1 %v3648_v46  ;;  %v1680_v46 = vld [vmem:[#allocation10 + $0x88] sm:$0xff] }
 0x4aa   :  { %2923 = vmatprep.subr.bf16.mxu1 %v3651_v50  ;;  %v1682_v50 = vld [vmem:[#allocation10 + $0x98] sm:$0xff] }
 0x4ad   :  { %2925 = vmatpush1.bf16.msra.mxu1 %v3660_v39  ;;  %v3799_v39 = vpack.c.bf16 %v1677_v32, %v1675_v28  ;;  %v1718_v28 = vld [vmem:[#allocation10 + $0x1b8] sm:$0xff]  ;;  %v3853_v32 = vpack.c.bf16 %v1713_v54, %v1711_v42 }
 0x4ae   :  { %2927 = vmatprep.subr.bf16.mxu1 %v3663_v57  ;;  %v3801_v57 = vpack.c.bf16 %v1682_v50, %v1680_v46  ;;  %v3855_v46 = vpack.c.bf16 %v1718_v28, %v1716_v60  ;;  %v1715_v50 = vld [vmem:[#allocation10 + $0x1a0] sm:$0xff] }
 0x4af   :  { %3081 = vmatpush1.bf16.msra.mxu0 %v3799_v39 }
 0x4b0   :  { %3083 = vmatprep.subr.bf16.mxu0 %v3801_v57 }
 0x4b1   :  { %2929 = vmatpush1.bf16.msra.mxu1 %v3665_v45  ;;  %v1679_v45 = vld [vmem:[#allocation10 + $0x80] sm:$0xff] }
 0x4b2   :  { %2931 = vmatprep.subr.bf16.mxu1 %v3669_v40  ;;  %v1681_v40 = vld [vmem:[#allocation10 + $0x90] sm:$0xff] }
 0x4b5   :  { %2933 = vmatpush1.bf16.msra.mxu1 %v3671_v2  ;;  %v1684_v2 = vld [vmem:[#allocation10 + $0xa8] sm:$0xff] }
 0x4b6   :  { %2935 = vmatprep.subr.bf16.mxu1 %v3675_v12  ;;  %v1686_v12 = vld [vmem:[#allocation10 + $0xb8] sm:$0xff] }
 0x4b7   :  { %v3807_v35 = vpack.c.bf16 %v1686_v12, %v1684_v2  ;;  %v1722_v2 = vld [vmem:[#allocation10 + $0x1d8] sm:$0xff] }
 0x4b9   :  { %2937 = vmatpush1.bf16.msra.mxu1 %v3677_v15  ;;  %v3805_v15 = vpack.c.bf16 %v1681_v40, %v1679_v45  ;;  %v1717_v45 = vld [vmem:[#allocation10 + $0x1b0] sm:$0xff]  ;;  %v1720_v40 = vld [vmem:[#allocation10 + $0x1c8] sm:$0xff] }
 0x4ba   :  { %2939 = vmatprep.subr.bf16.mxu1 %v3777_v4  ;;  %v3859_v12 = vpack.c.bf16 %v1717_v45, %v1715_v50  ;;  %v3861_v36 = vpack.c.bf16 %v1722_v2, %v1720_v40  ;;  %v2129_v50 = vld [vmem:[#allocation11 + $0x28] sm:$0xff]  ;;  %v2146_v45 = vld [vmem:[#allocation11 + $0xb0] sm:$0xff]  ;;  %v2147_v40 = vld [vmem:[#allocation11 + $0xb8] sm:$0xff] }
 0x4bb   :  { %3085 = vmatpush1.bf16.msra.mxu0 %v3805_v15 }
 0x4bc   :  { %3087 = vmatprep.subr.bf16.mxu0 %v3807_v35 }
 0x4bf   :  { %3089 = vmatpush1.bf16.msra.mxu0 %v3811_v44 }
 0x4c0   :  { %3091 = vmatprep.subr.bf16.mxu0 %v3813_v8 }
 0x4c3   :  { %3093 = vmatpush1.bf16.msra.mxu0 %v3817_v59 }
 0x4c4   :  { %3095 = vmatprep.subr.bf16.mxu0 %v3819_v63 }
 0x4c7   :  { %3097 = vmatpush1.bf16.msra.mxu0 %v3823_v61 }
 0x4c8   :  { %3099 = vmatprep.subr.bf16.mxu0 %v3825_v5 }
 0x4cb   :  { %3101 = vmatpush1.bf16.msra.mxu0 %v3829_v20 }
 0x4cc   :  { %3103 = vmatprep.subr.bf16.mxu0 %v3831_v56 }
 0x4cf   :  { %3105 = vmatpush1.bf16.msra.mxu0 %v3835_v23 }
 0x4d0   :  { %3107 = vmatprep.subr.bf16.mxu0 %v3837_v27 }
 0x4d3   :  { %3109 = vmatpush1.bf16.msra.mxu0 %v3841_v21 }
 0x4d4   :  { %3111 = vmatprep.subr.bf16.mxu0 %v3843_v30 }
 0x4d7   :  { %3113 = vmatpush1.bf16.msra.mxu0 %v3847_v0 }
 0x4d8   :  { %3115 = vmatprep.subr.bf16.mxu0 %v3849_v37 }
 0x4db   :  { %3117 = vmatpush1.bf16.msra.mxu0 %v3853_v32 }
 0x4dc   :  { %3119 = vmatprep.subr.bf16.mxu0 %v3855_v46 }
 0x4df   :  { %3121 = vmatpush1.bf16.msra.mxu0 %v3859_v12 }
 0x4e0   :  { %3123 = vmatprep.subr.bf16.mxu0 %v3861_v36 }
 0x4e3   :  { %3125 = vmatpush1.bf16.msra.mxu0 %v2996_v17 }
 0x4e4   :  { %3127 = vmatprep.subr.bf16.mxu0 %v2998_v25 }
 0x4e7   :  { %3129 = vmatpush1.bf16.msra.mxu0 %v3000_v3 }
 0x54f   :  { %v1495_v38 = vpop.f32.mrb[4].mxu1 }
 0x550   :  { %v1502_v41 = vrot.slane %v1495_v38, 2  ;;  %v1497_v43 = vpop.f32.mrb[5].mxu1  ;;  %v2131_v38 = vld [vmem:[#allocation11 + $0x38] sm:$0xff] }
 0x551   :  { %v1503_v51 = vrot.slane %v1497_v43, 2  ;;  %v2149_v43 = vld [vmem:[#allocation11 + $0xc8] sm:$0xff] }
 0x552   :  { %v1506_v52 = vadd.f32 %v1502_v41, %v1357_v49  ;;  %v2148_v41 = vld [vmem:[#allocation11 + $0xc0] sm:$0xff] }
 0x553   :  { %v1507_v47 = vadd.f32 %v1503_v51, %v1358_v53  ;;  %v3146_v51 = vpack.c.bf16 %v2149_v43, %v2148_v41  ;;  %v2133_v53 = vld [vmem:[#allocation11 + $0x48] sm:$0xff] }
 0x554   :  { %v1508_v55 = vmax.f32 %v1506_v52, 0.0  ;;  %v2132_v52 = vld [vmem:[#allocation11 + $0x40] sm:$0xff] }
 0x555   :  { %v1509_v31 = vmax.f32 %v1507_v47, 0.0  ;;  %v2150_v47 = vld [vmem:[#allocation11 + $0xd0] sm:$0xff] }
 0x556   :  { %1510 = vst [vmem:[#allocation4] sm:$0xc0] %v1508_v55  ;;  %v1580_v6 = vrot.slane %v1508_v55, 6  ;;  %v2151_v55 = vld [vmem:[#allocation11 + $0xd8] sm:$0xff] }
 0x557   :  { %1511 = vst [vmem:[#allocation4 + $0x8] sm:$0xc0] %v1509_v31  ;;  %v1581_v1 = vrot.slane %v1509_v31, 6  ;;  %v3148_v31 = vpack.c.bf16 %v2133_v53, %v2132_v52 }
 0x559   :  { %1648 = vmatprep.mubr.f32.mxu1 %v1581_v1  ;;  %v3150_v1 = vpack.c.bf16 %v2151_v55, %v2150_v47 }
 0x55a   :  { %1649 = vmatmul.mubr.f32.vlgmr.msra.gmra.mrb[6].mxu1 %v1580_v6  ;;  %v2134_v6 = vld [vmem:[#allocation11 + $0x50] sm:$0xff] }
 0x55b   :  { %2941 = vmatpush1.bf16.msra.mxu1 %v3779_v19  ;;  %v3152_v22 = vpack.c.bf16 %v2135_v13, %v2134_v6 }
 0x55c   :  { %2943 = vmatprep.subr.bf16.mxu1 %v3782_v48 }
 0x55e   :  { %v2121_v60 = vld [vmem:[#allocation4 + $0x8] sm:$0xff] }
 0x55f   :  { %2945 = vmatpush1.bf16.msra.mxu1 %v3787_v24 }
 0x560   :  { %2947 = vmatprep.subr.bf16.mxu1 %v3789_v26 }
 0x563   :  { %2949 = vmatpush1.bf16.msra.mxu1 %v3793_v9 }
 0x564   :  { %2951 = vmatprep.subr.bf16.mxu1 %v3795_v14 }
 0x567   :  { %2953 = vmatpush1.bf16.msra.mxu1 %v3799_v39 }
 0x568   :  { %2955 = vmatprep.subr.bf16.mxu1 %v3801_v57 }
 0x56b   :  { %2957 = vmatpush1.bf16.msra.mxu1 %v3805_v15 }
 0x56c   :  { %2959 = vmatprep.subr.bf16.mxu1 %v3807_v35 }
 0x56f   :  { %2961 = vmatpush1.bf16.msra.mxu1 %v3811_v44 }
 0x570   :  { %2963 = vmatprep.subr.bf16.mxu1 %v3813_v8 }
 0x573   :  { %2965 = vmatpush1.bf16.msra.mxu1 %v3817_v59 }
 0x574   :  { %2967 = vmatprep.subr.bf16.mxu1 %v3819_v63 }
 0x577   :  { %2969 = vmatpush1.bf16.msra.mxu1 %v3823_v61 }
 0x578   :  { %2971 = vmatprep.subr.bf16.mxu1 %v3825_v5 }
 0x57b   :  { %2973 = vmatpush1.bf16.msra.mxu1 %v3829_v20 }
 0x57c   :  { %2975 = vmatprep.subr.bf16.mxu1 %v3831_v56 }
 0x57f   :  { %2977 = vmatpush1.bf16.msra.mxu1 %v3835_v23 }
 0x580   :  { %2979 = vmatprep.subr.bf16.mxu1 %v3837_v27 }
 0x583   :  { %2981 = vmatpush1.bf16.msra.mxu1 %v3841_v21 }
 0x584   :  { %2983 = vmatprep.subr.bf16.mxu1 %v3843_v30 }
 0x587   :  { %2985 = vmatpush1.bf16.msra.mxu1 %v3847_v0 }
 0x588   :  { %2987 = vmatprep.subr.bf16.mxu1 %v3849_v37 }
 0x58b   :  { %2989 = vmatpush1.bf16.msra.mxu1 %v3853_v32 }
 0x58c   :  { %2991 = vmatprep.subr.bf16.mxu1 %v3855_v46 }
 0x58f   :  { %2993 = vmatpush1.bf16.msra.mxu1 %v3859_v12 }
 0x590   :  { %2995 = vmatprep.subr.bf16.mxu1 %v3861_v36 }
 0x593   :  { %2997 = vmatpush1.bf16.msra.mxu1 %v2996_v17 }
 0x594   :  { %2999 = vmatprep.subr.bf16.mxu1 %v2998_v25 }
 0x597   :  { %3001 = vmatpush1.bf16.msra.mxu1 %v3000_v3 }
 0x598   :  { %3003 = vmatprep.subr.bf16.mxu1 %v3777_v4  ;;  %v2140_v4 = vld [vmem:[#allocation11 + $0x80] sm:$0xff] }
 0x62d   :  { %v1650_v11 = vpop.f32.mrb[6].mxu1 }
 0x62e   :  { %v1655_v33 = vadd.f32 %v1650_v11, %v1512_v10  ;;  %v1652_v62 = vpop.f32.mrb[7].mxu1 }
 0x62f   :  { %v1656_v7 = vadd.f32 %v1652_v62, %v1513_v58  ;;  %v2139_v58 = vld [vmem:[#allocation11 + $0x78] sm:$0xff] }
 0x630   :  { %v1657_v42 = vmax.f32 %v1655_v33, 0.0  ;;  %v2138_v33 = vld [vmem:[#allocation11 + $0x70] sm:$0xff] }
 0x631   :  { %v1658_v54 = vmax.f32 %v1656_v7, 0.0  ;;  %v3160_v62 = vpack.c.bf16 %v2139_v58, %v2138_v33  ;;  %v2120_v7 = vld [vmem:[#allocation4] sm:$0xff] }
 0x632   :  { %1659 = vst [vmem:[#allocation4 + $0x10] sm:$0x3] %v1657_v42 }
 0x633   :  { %1660 = vst [vmem:[#allocation4 + $0x18] sm:$0x3] %v1658_v54  ;;  %1791 = vmatprep.mubr.f32.mxu1 %v1658_v54 }
 0x634   :  { %1792 = vmatmul.mubr.f32.vlgmr.msra.gmra.mrb[8].mxu1 %v1657_v42 }
 0x635   :  { %3005 = vmatpush1.bf16.msra.mxu1 %v3779_v19  ;;  %v2141_v19 = vld [vmem:[#allocation11 + $0x88] sm:$0xff] }
 0x636   :  { %3007 = vmatprep.subr.bf16.mxu1 %v3782_v48  ;;  %v3130_v48 = vpack.c.bf16 %v2141_v19, %v2140_v4  ;;  %v1810_v19 = vld [vmem:[#allocation3 + $0x10] sm:$0x30] }
 0x639   :  { %3009 = vmatpush1.bf16.msra.mxu1 %v3787_v24 }
 0x63a   :  { %3011 = vmatprep.subr.bf16.mxu1 %v3789_v26 }
 0x63d   :  { %3013 = vmatpush1.bf16.msra.mxu1 %v3793_v9 }
 0x63e   :  { %3015 = vmatprep.subr.bf16.mxu1 %v3795_v14  ;;  %v1661_v14 = vld [vmem:[#allocation3 + $0x10] sm:$0xc] }
 0x641   :  { %3017 = vmatpush1.bf16.msra.mxu1 %v3799_v39 }
 0x642   :  { %3019 = vmatprep.subr.bf16.mxu1 %v3801_v57 }
 0x645   :  { %3021 = vmatpush1.bf16.msra.mxu1 %v3805_v15  ;;  %v1662_v15 = vld [vmem:[#allocation3 + $0x18] sm:$0xc] }
 0x646   :  { %3023 = vmatprep.subr.bf16.mxu1 %v3807_v35 }
 0x649   :  { %3025 = vmatpush1.bf16.msra.mxu1 %v3811_v44 }
 0x64a   :  { %3027 = vmatprep.subr.bf16.mxu1 %v3813_v8  ;;  %v2124_v8 = vld [vmem:[#allocation11] sm:$0xff] }
 0x64d   :  { %3029 = vmatpush1.bf16.msra.mxu1 %v3817_v59  ;;  %v2125_v59 = vld [vmem:[#allocation11 + $0x8] sm:$0xff] }
 0x64e   :  { %3031 = vmatprep.subr.bf16.mxu1 %v3819_v63 }
 0x651   :  { %3033 = vmatpush1.bf16.msra.mxu1 %v3823_v61  ;;  %v2142_v61 = vld [vmem:[#allocation11 + $0x90] sm:$0xff] }
 0x652   :  { %3035 = vmatprep.subr.bf16.mxu1 %v3825_v5  ;;  %v2143_v5 = vld [vmem:[#allocation11 + $0x98] sm:$0xff] }
 0x655   :  { %3037 = vmatpush1.bf16.msra.mxu1 %v3829_v20 }
 0x656   :  { %3039 = vmatprep.subr.bf16.mxu1 %v3831_v56  ;;  %v3132_v56 = vpack.c.bf16 %v2125_v59, %v2124_v8 }
 0x659   :  { %3041 = vmatpush1.bf16.msra.mxu1 %v3835_v23 }
 0x65a   :  { %3043 = vmatprep.subr.bf16.mxu1 %v3837_v27  ;;  %v3134_v27 = vpack.c.bf16 %v2143_v5, %v2142_v61 }
 0x65d   :  { %3045 = vmatpush1.bf16.msra.mxu1 %v3841_v21  ;;  %v2126_v21 = vld [vmem:[#allocation11 + $0x10] sm:$0xff] }
 0x65e   :  { %3047 = vmatprep.subr.bf16.mxu1 %v3843_v30  ;;  %v2127_v30 = vld [vmem:[#allocation11 + $0x18] sm:$0xff] }
 0x65f   :  { %v3136_v28 = vpack.c.bf16 %v2127_v30, %v2126_v21  ;;  %v1966_v21 = vld [vmem:[#allocation3 + $0x18] sm:$0xc0] }
 0x661   :  { %3049 = vmatpush1.bf16.msra.mxu1 %v3847_v0  ;;  %v2144_v0 = vld [vmem:[#allocation11 + $0xa0] sm:$0xff] }
 0x662   :  { %3051 = vmatprep.subr.bf16.mxu1 %v3849_v37  ;;  %v2145_v37 = vld [vmem:[#allocation11 + $0xa8] sm:$0xff] }
 0x665   :  { %3053 = vmatpush1.bf16.msra.mxu1 %v3853_v32  ;;  %v3138_v32 = vpack.c.bf16 %v2145_v37, %v2144_v0 }
 0x666   :  { %3055 = vmatprep.subr.bf16.mxu1 %v3855_v46  ;;  %v2128_v46 = vld [vmem:[#allocation11 + $0x20] sm:$0xff] }
 0x667   :  { %v3140_v2 = vpack.c.bf16 %v2129_v50, %v2128_v46 }
 0x669   :  { %3057 = vmatpush1.bf16.msra.mxu1 %v3859_v12  ;;  %v3142_v12 = vpack.c.bf16 %v2147_v40, %v2146_v45 }
 0x66a   :  { %3059 = vmatprep.subr.bf16.mxu1 %v3861_v36  ;;  %v2130_v36 = vld [vmem:[#allocation11 + $0x30] sm:$0xff] }
 0x66b   :  { %v3144_v49 = vpack.c.bf16 %v2131_v38, %v2130_v36 }
 0x66d   :  { %3061 = vmatpush1.bf16.msra.mxu1 %v2996_v17  ;;  %v2153_v17 = vld [vmem:[#allocation11 + $0xe8] sm:$0xff] }
 0x66e   :  { %3063 = vmatprep.subr.bf16.mxu1 %v2998_v25  ;;  %v3154_v18 = vpack.c.bf16 %v2153_v17, %v2152_v16  ;;  %v2136_v25 = vld [vmem:[#allocation11 + $0x60] sm:$0xff] }
 0x66f   :  { %v3156_v10 = vpack.c.bf16 %v2137_v29, %v2136_v25 }
 0x671   :  { %3065 = vmatpush1.bf16.msra.mxu1 %v3000_v3  ;;  %v2155_v3 = vld [vmem:[#allocation11 + $0xf8] sm:$0xff] }
 0x672   :  { %3131 = vmatprep.subr.bf16.mxu1 %v3130_v48  ;;  %v3158_v11 = vpack.c.bf16 %v2155_v3, %v2154_v34 }
 0x707   :  { %v1793_v24 = vpop.f32.mrb[8].mxu1 }
 0x708   :  { %v1800_v26 = vrot.slane %v1793_v24, 6  ;;  %v1795_v9 = vpop.f32.mrb[9].mxu1 }
 0x709   :  { %v1801_v39 = vrot.slane %v1795_v9, 6 }
 0x70a   :  { %v1804_v57 = vadd.f32 %v1800_v26, %v1661_v14  ;;  %v1811_v26 = vld [vmem:[#allocation3 + $0x18] sm:$0x30] }
 0x70b   :  { %v1805_v35 = vadd.f32 %v1801_v39, %v1662_v15 }
 0x70c   :  { %v1806_v44 = vmax.f32 %v1804_v57, 0.0 }
 0x70d   :  { %v1807_v63 = vmax.f32 %v1805_v35, 0.0 }
 0x70e   :  { %1808 = vst [vmem:[#allocation4 + $0x10] sm:$0xc] %v1806_v44  ;;  %v1878_v23 = vrot.slane %v1806_v44, 2  ;;  %v2259_v44 = vld [vmem:[#allocation13] ss:$0 sm:$0xff] }
 0x70f   :  { %1809 = vst [vmem:[#allocation4 + $0x18] sm:$0xc] %v1807_v63  ;;  %v1879_v20 = vrot.slane %v1807_v63, 2 }
 0x711   :  { %1946 = vmatprep.mubr.f32.mxu1 %v1879_v20 }
 0x712   :  { %1947 = vmatmul.mubr.f32.vlgmr.msra.gmra.mrb[10].mxu1 %v1878_v23 }
 0x713   :  { %3133 = vmatpush3.bf16.msra.mxu1 %v3132_v56  ;;  %2227 = vmatprep.mubr.f32.mxu1 %v2121_v60  ;;  %v1965_v56 = vld [vmem:[#allocation3 + $0x10] sm:$0xc0] }
 0x714   :  { %3135 = vmatprep.subr.bf16.mxu1 %v3134_v27 }
 0x717   :  { %3137 = vmatpush3.bf16.msra.mxu1 %v3136_v28 }
 0x718   :  { %3139 = vmatprep.subr.bf16.mxu1 %v3138_v32 }
 0x71b   :  { %3141 = vmatpush3.bf16.msra.mxu1 %v3140_v2 }
 0x71c   :  { %3143 = vmatprep.subr.bf16.mxu1 %v3142_v12 }
 0x71f   :  { %3145 = vmatpush3.bf16.msra.mxu1 %v3144_v49 }
 0x720   :  { %3147 = vmatprep.subr.bf16.mxu1 %v3146_v51 }
 0x723   :  { %3149 = vmatpush3.bf16.msra.mxu1 %v3148_v31 }
 0x724   :  { %3151 = vmatprep.subr.bf16.mxu1 %v3150_v1 }
 0x727   :  { %3153 = vmatpush3.bf16.msra.mxu1 %v3152_v22 }
 0x728   :  { %3155 = vmatprep.subr.bf16.mxu1 %v3154_v18 }
 0x72b   :  { %3157 = vmatpush3.bf16.msra.mxu1 %v3156_v10 }
 0x72c   :  { %3159 = vmatprep.subr.bf16.mxu1 %v3158_v11 }
 0x72f   :  { %3161 = vmatpush3.bf16.msra.mxu1 %v3160_v62 }
 0x732   :  { %2228 = vmatmul.mubr.f32.vlgmr.msra.gmra.mrb[12].mxu1 %v2120_v7 }
 0x7e5   :  { %v1948_v42 = vpop.f32.mrb[10].mxu1 }
 0x7e6   :  { %v1955_v54 = vrot.slane %v1948_v42, 4  ;;  %v1950_v4 = vpop.f32.mrb[11].mxu1 }
 0x7e7   :  { %v1956_v48 = vrot.slane %v1950_v4, 4 }
 0x7e8   :  { %v1959_v24 = vadd.f32 %v1955_v54, %v1810_v19 }
 0x7e9   :  { %v1960_v9 = vadd.f32 %v1956_v48, %v1811_v26 }
 0x7ea   :  { %v1961_v14 = vmax.f32 %v1959_v24, 0.0 }
 0x7eb   :  { %v1962_v39 = vmax.f32 %v1960_v9, 0.0 }
 0x7ec   :  { %1963 = vst [vmem:[#allocation4 + $0x10] sm:$0x30] %v1961_v14  ;;  %v2033_v15 = vrot.slane %v1961_v14, 4 }
 0x7ed   :  { %1964 = vst [vmem:[#allocation4 + $0x18] sm:$0x30] %v1962_v39  ;;  %v2034_v57 = vrot.slane %v1962_v39, 4 }
 0x7ef   :  { %2101 = vmatprep.mubr.f32.mxu0 %v2034_v57 }
 0x7f0   :  { %2102 = vmatmul.mubr.f32.vlgmr.msra.gmra.mrb[4].mxu0 %v2033_v15 }
 0x805   :  { %v2292_v35 = vpop.f32.mrb[12].mxu1 }
 0x806   :  { %v2293_v8 = vpop.f32.mrb[13].mxu1 }
 0x807   :  { %v2294_v59 = vadd.f32 %v2293_v8, %v2292_v35 }
 0x809   :  { %v2230_v63 = vadd.f32 %v2294_v59, %v2259_v44 }
 0x80b   :  { %2238 = vst [vmem:[#allocation14] sm:$0xff] %v2230_v63 }
 0x8c3   :  { %v2103_v61 = vpop.f32.mrb[4].mxu0 }
 0x8c4   :  { %v2110_v5 = vrot.slane %v2103_v61, 2  ;;  %v2105_v20 = vpop.f32.mrb[5].mxu0 }
 0x8c5   :  { %v2111_v23 = vrot.slane %v2105_v20, 2 }
 0x8c6   :  { %v2114_v27 = vadd.f32 %v2110_v5, %v1965_v56 }
 0x8c7   :  { %v2115_v30 = vadd.f32 %v2111_v23, %v1966_v21 }
 0x8c8   :  { %v2116_v0 = vmax.f32 %v2114_v27, 0.0 }
 0x8c9   :  { %v2117_v37 = vmax.f32 %v2115_v30, 0.0 }
 0x8ca   :  { %2118 = vst [vmem:[#allocation4 + $0x10] sm:$0xc0] %v2116_v0 }
 0x8cb   :  { %2119 = vst [vmem:[#allocation4 + $0x18] sm:$0xc0] %v2117_v37 }
 0x8d1   :  { %v2122_v28 = vld [vmem:[#allocation4 + $0x10] sm:$0xff] }
 0x8d2   :  { %v2123_v60 = vld [vmem:[#allocation4 + $0x18] sm:$0xff] }
 0x8d3   :  { %2232 = vmatprep.mubr.f32.mxu1 %v2123_v60 }
 0x8d4   :  { %2233 = vmatmul.mubr.f32.gmra.mrb[14].mxu1 %v2122_v28 }
 0x9a7   :  { %v2295_v32 = vpop.f32.mrb[14].mxu1 }
 0x9a8   :  { %v2296_v46 = vpop.f32.mrb[15].mxu1 }
 0x9a9   :  { %v2297_v50 = vadd.f32 %v2296_v46, %v2295_v32 }
 0x9ab   :  { %v2235_v45 = vadd.f32 %v2297_v50, %v2259_v44 }
 0x9ad   :  { %2239 = vst [vmem:[#allocation14 + $0x8] sm:$0xff] %v2235_v45 }
 0x9ae   :  { %3318 = shalt.err (!%p3315_p2)
}
 0x9af   :  { %s3319_s3 = scalar_lea.hbm %s3943_s6, 256 }
 0x9b0   :  { %p3320_p3 = scmp.ne.s32.totalorder %s3943_s6, %s3319_s3  ;;  %p3323_p4 = scmp.lt.u32.totalorder %s3319_s3, %s3943_s6 }
 0x9b2   :  { %p3325_p5 = pnand %p3323_p4, %p3320_p3 }
 0x9b4   :  { %3328 = shalt.err (!%p3325_p5)
}
 0x9b5   :  { %2251 = dma.vmem_to_hbm [thread:$0]  %s2246_s7, 256, %s3943_s6, [#allocation7], %s3339_s2, %s3339_s2, %s3340_s19  }
 0x9b6   :  { %3335 = dma.done.wait [#allocation7], 256  }
 0x9b7   :  { %3336 = vsyncadd [#allocation7], 4294967040 }
 0x9b8   :  { %2255 = vsyncpa [#allocation6], 1 }
 0x9b9   :  { %2256 = vsyncpa [#allocation9], 1 }
 0x9ba   :  { %2257 = vsyncpa [#allocation12], 1 }
 0x9bb   :  { %2258 = vsyncpa [#allocation7], 1 }

</bundles_post_ra>
